<compile_context>
chip_gen: v5e
topology: v5e:2x2
jax: 0.10.0
libtpu: 0.0.40
codegen_flags: <defaults>
</compile_context>

<pallas_src>
import functools

import jax
import jax.numpy as jnp
import numpy as np
from jax.experimental import pallas as pl
from jax.experimental.pallas import tpu as pltpu


# ---------------------------------------------------------------------------
# Fused Pallas kernel
# ---------------------------------------------------------------------------

def _flow_step_kernel(x_ref, mask_ref, wf_ref, bf_ref, w1_ref, b1_ref,
                      w2_ref, b2_ref, w3_ref, b3_ref, o_ref, dld_ref, *, W):
    x = x_ref[...]                                   # (C, L), channel-major
    C, L = x.shape
    ch = C // 2
    mask = mask_ref[...]                             # (9, 1, L) 0/1 tap masks

    # ActNorm folded into the invertible 1x1 conv; the folded weight is
    # zero-padded to 8 output rows so the conv1 tap stack stays tile-aligned.
    z8 = jnp.dot(wf_ref[...], x, preferred_element_type=jnp.float32) + bf_ref[...]
    z = z8[:C, :]                                    # rows C..7 are exactly 0

    def tap_stack(v):
        """Stack the 9 shifted/masked 3x3 taps of v along the sublane axis.

        v: (rows, L) with rows % 8 == 0.  Returns (9*rows, L), tap-major /
        channel-minor, matching the tap-major fused weight layout.
        """
        pieces = []
        t = 0
        for oi in (-1, 0, 1):
            for oj in (-1, 0, 1):
                d = oi * W + oj                      # source = dest + d (flat)
                if d == 0:
                    pieces.append(v)
                else:
                    tap = pltpu.roll(v, (-d) % L, 1)     # XLU lane rotation
                    pieces.append(tap * mask[t])         # zero boundary / wrap
                t += 1
        return jnp.concatenate(pieces, axis=0)       # 8- or 32-row aligned

    # Coupling NN: conv3x3 -> ReLU -> conv1x1 -> ReLU -> conv3x3; each conv is
    # a single fused matmul against the stacked taps.
    h1 = jnp.maximum(
        jnp.dot(w1_ref[...], tap_stack(z8),
                preferred_element_type=jnp.float32) + b1_ref[...], 0.0)
    h2 = jnp.maximum(
        jnp.dot(w2_ref[...], h1,
                preferred_element_type=jnp.float32) + b2_ref[...], 0.0)
    # conv3 emits 8 rows: rows [0:C) hold the shift map aligned to output rows,
    # rows [4:4+C) hold the raw scale pre-activation (unused rows are zero).
    h3 = jnp.dot(w3_ref[...], tap_stack(h2),
                 preferred_element_type=jnp.float32) + b3_ref[...]

    shift_f = h3[:C, :]
    raw_f = h3[4:4 + C, :] + 2.0
    scale_f = jax.nn.sigmoid(raw_f)

    row = jax.lax.broadcasted_iota(jnp.int32, (C, L), 0)
    pass_thru = row < ch

    # Affine coupling + single full-tile store.
    o_ref[...] = jnp.where(pass_thru, z, (z + shift_f) * scale_f)

    # Per-lane channel-summed log-scale (stable log-sigmoid); the spatial
    # reduction finishes in the wrapper.
    log_scale = jnp.minimum(raw_f, 0.0) - jnp.log(1.0 + jnp.exp(-jnp.abs(raw_f)))
    dld_ref[...] = jnp.sum(jnp.where(pass_thru, 0.0, log_scale),
                           axis=0, keepdims=True)


# ---------------------------------------------------------------------------
# Parameter / mask preparation (hoisted: once per parameter set)
# ---------------------------------------------------------------------------

def _tap_boundary_mask(H, W, samples_per_block):
    """(9, 1, samples_per_block*H*W) 0/1 masks over destination positions."""
    HW = H * W
    p = np.arange(HW)
    col = p % W
    rowi = p // W
    masks = []
    for oi in (-1, 0, 1):
        for oj in (-1, 0, 1):
            m = np.ones(HW, np.float32)
            if oi == -1:
                m = m * (rowi >= 1)
            elif oi == 1:
                m = m * (rowi <= H - 2)
            if oj == -1:
                m = m * (col >= 1)
            elif oj == 1:
                m = m * (col <= W - 2)
            masks.append(np.tile(m.astype(np.float32), samples_per_block))
    return jnp.asarray(np.stack(masks)[:, None, :], dtype=jnp.float32)


def prepare_flow_step(params, H, W, samples_per_block):
    """Parameter-only preparation (ActNorm fold, fused/padded weights, masks)."""
    C = params["inv_w"].shape[0]
    ch = C // 2
    hidden = params["w2"].shape[0]
    assert C % 2 == 0 and C <= 4, "padded 8-row packing assumes C <= 4"
    # TODO(synk): generalize the 8-row packing for C > 4.

    # Fold ActNorm (bias, exp(logs)) into the 1x1 conv:  z = W' x + b'.
    s = jnp.exp(params["an_logs"])
    wf = params["inv_w"] * s[None, :]                          # (C, C)
    bf = wf @ params["an_bias"]                                # (C,)
    wf8 = jnp.zeros((8, C), jnp.float32).at[:C, :].set(wf)
    bf8 = jnp.zeros((8, 1), jnp.float32).at[:C, 0].set(bf)

    # conv1 (3x3, ch -> hidden): tap-major columns, channels padded ch -> 8.
    w1r = params["w1"].reshape(9, ch, hidden)
    w1p = jnp.zeros((9, 8, hidden), jnp.float32).at[:, :ch, :].set(w1r)
    w1f = w1p.reshape(9 * 8, hidden).T                         # (hidden, 72)
    b1 = params["b1"][:, None]

    # conv2 (1x1, hidden -> hidden).
    w2f = params["w2"].T
    b2 = params["b2"][:, None]

    # conv3 (3x3, hidden -> C): one 8-row matmul emitting shift rows [ch:C)
    # and raw-scale rows [4+ch:4+C); unused rows are zero.
    w3f = params["w3"].T                                       # (C, 9*hidden)
    b3 = params["b3"]
    w3m = jnp.zeros((8, 9 * hidden), jnp.float32)
    w3m = w3m.at[ch:C, :].set(w3f[:ch, :])
    w3m = w3m.at[4 + ch:4 + C, :].set(w3f[ch:, :])
    b3m = jnp.zeros((8, 1), jnp.float32)
    b3m = b3m.at[ch:C, 0].set(b3[:ch])
    b3m = b3m.at[4 + ch:4 + C, 0].set(b3[ch:])

    # Parameter-only log-det terms (per pixel).  slogdet of the tiny CxC
    # weight has no Pallas equivalent -> plain JAX, once per parameter set.
    dlogdet_const = (jnp.sum(params["an_logs"])
                     + jnp.linalg.slogdet(params["inv_w"])[1]) * (H * W)

    return {
        "wf8": wf8, "bf8": bf8, "w1f": w1f, "b1": b1, "w2f": w2f, "b2": b2,
        "w3m": w3m, "b3m": b3m,
        "mask": _tap_boundary_mask(H, W, samples_per_block),
        "dlogdet_const": dlogdet_const,
    }


def default_samples_per_block(B):
    """Pack the whole batch along lanes on single-TensorCore chips (v5e/v6e);
    keep one sample per 'parallel' grid step on multi-TC chips (v7x, megacore)."""
    try:
        kind = jax.devices()[0].device_kind.lower()
    except Exception:
        return 1
    single_tc = any(t in kind for t in
                    ("v5 lite", "v5e", "v5lite", "v6 lite", "v6e", "v6lite"))
    return B if single_tc else 1


# ---------------------------------------------------------------------------
# Forward wrapper
# ---------------------------------------------------------------------------

def flow_step_forward(prepped, x_nchw, conditioning, logdet, *,
                      samples_per_block=1):
    """FlowStep.normal_flow (reverse=False)."""
    del conditioning                      # conditional=False in this instance
    B, C, H, W = x_nchw.shape
    HW = H * W
    spb = samples_per_block
    assert B % spb == 0
    G = B // spb
    L = spb * HW
    hidden = prepped["w2f"].shape[0]

    # NCHW -> channel-major (C, B*HW) with samples packed along lanes.
    x_cm = jnp.transpose(x_nchw.astype(jnp.float32).reshape(B, C, HW),
                         (1, 0, 2)).reshape(C, B * HW)

    flops = 2 * B * HW * (8 * C + hidden * 72 + hidden * hidden + 8 * 9 * hidden)
    bytes_accessed = 4 * (2 * B * C * HW + B * HW
                          + sum(int(np.prod(prepped[k].shape))
                                for k in ("wf8", "bf8", "w1f", "b1", "w2f",
                                          "b2", "w3m", "b3m", "mask")))

    kernel = functools.partial(_flow_step_kernel, W=W)
    z_cm, dld = pl.pallas_call(
        kernel,
        out_shape=(jax.ShapeDtypeStruct((C, B * HW), jnp.float32),
                   jax.ShapeDtypeStruct((1, B * HW), jnp.float32)),
        grid=(G,),
        in_specs=[
            pl.BlockSpec((C, L), lambda g: (0, g)),            # x (per block)
            pl.BlockSpec((9, 1, L), lambda g: (0, 0, 0)),      # tap masks
            pl.BlockSpec((8, C), lambda g: (0, 0)),            # folded invconv W'
            pl.BlockSpec((8, 1), lambda g: (0, 0)),            # folded bias b'
            pl.BlockSpec((hidden, 72), lambda g: (0, 0)),      # conv1 fused taps
            pl.BlockSpec((hidden, 1), lambda g: (0, 0)),       # b1
            pl.BlockSpec((hidden, hidden), lambda g: (0, 0)),  # conv2 (1x1)
            pl.BlockSpec((hidden, 1), lambda g: (0, 0)),       # b2
            pl.BlockSpec((8, 9 * hidden), lambda g: (0, 0)),   # conv3 fused taps
            pl.BlockSpec((8, 1), lambda g: (0, 0)),            # b3 (padded rows)
        ],
        out_specs=(
            pl.BlockSpec((C, L), lambda g: (0, g)),            # z out
            pl.BlockSpec((1, L), lambda g: (0, g)),            # log-scale row
        ),
        compiler_params=pltpu.CompilerParams(
            dimension_semantics=("parallel",)),
        cost_estimate=pl.CostEstimate(flops=flops,
                                      transcendentals=3 * B * HW * C,
                                      bytes_accessed=bytes_accessed),
    )(x_cm, prepped["mask"], prepped["wf8"], prepped["bf8"], prepped["w1f"],
      prepped["b1"], prepped["w2f"], prepped["b2"], prepped["w3m"],
      prepped["b3m"])

    z = jnp.transpose(z_cm.reshape(C, B, HW), (1, 0, 2)).reshape(B, C, H, W)
    logdet = (logdet + prepped["dlogdet_const"]
              + jnp.sum(dld.reshape(B, HW), axis=-1))
    return z, logdet


# ---------------------------------------------------------------------------
# Pure-JAX reference (same math, no Pallas) for verification
# ---------------------------------------------------------------------------

def im2col3x3(x_nhwc):
    """3x3 'same' patches, tap-major / channel-minor ordering."""
    B, H, W, Cc = x_nhwc.shape
    xp = jnp.pad(x_nhwc, ((0, 0), (1, 1), (1, 1), (0, 0)))
    taps = [xp[:, di:di + H, dj:dj + W, :] for di in range(3) for dj in range(3)]
    return jnp.concatenate(taps, axis=-1)  # (B, H, W, 9*Cc)


def reference_forward(params, x_nchw, logdet):
    x = jnp.transpose(x_nchw, (0, 2, 3, 1))
    B, H, W, C = x.shape
    pixels = H * W
    ch = C // 2

    z = (x + params["an_bias"]) * jnp.exp(params["an_logs"])
    logdet = logdet + jnp.sum(params["an_logs"]) * pixels

    z = jnp.einsum("bhwc,oc->bhwo", z, params["inv_w"])
    logdet = logdet + jnp.linalg.slogdet(params["inv_w"])[1] * pixels

    z1, z2 = z[..., :ch], z[..., ch:]
    h1 = jax.nn.relu(jnp.einsum("bhwk,kn->bhwn", im2col3x3(z1), params["w1"])
                     + params["b1"])
    h2 = jax.nn.relu(jnp.einsum("bhwk,kn->bhwn", h1, params["w2"]) + params["b2"])
    h3 = jnp.einsum("bhwk,kn->bhwn", im2col3x3(h2), params["w3"]) + params["b3"]
    shift, scale_raw = h3[..., :ch], h3[..., ch:]
    scale = jax.nn.sigmoid(scale_raw + 2.0)
    z2n = (z2 + shift) * scale
    logdet = logdet + jnp.sum(jnp.log(scale), axis=(1, 2, 3))
    z_out = jnp.concatenate([z1, z2n], axis=-1)
    return jnp.transpose(z_out, (0, 3, 1, 2)), logdet


# ---------------------------------------------------------------------------

def make_params(key, C, hidden):
    ch = C // 2
    ks = jax.random.split(key, 8)
    inv_w, _ = jnp.linalg.qr(jax.random.normal(ks[2], (C, C), jnp.float32))
    return {
        "an_bias": 0.1 * jax.random.normal(ks[0], (C,), jnp.float32),
        "an_logs": 0.1 * jax.random.normal(ks[1], (C,), jnp.float32),
        "inv_w": inv_w,                                    # orthogonal init (Glow)
        "w1": 0.05 * jax.random.normal(ks[3], (9 * ch, hidden), jnp.float32),
        "b1": jnp.zeros((hidden,), jnp.float32),
        "w2": 0.05 * jax.random.normal(ks[4], (hidden, hidden), jnp.float32),
        "b2": jnp.zeros((hidden,), jnp.float32),
        "w3": 0.05 * jax.random.normal(ks[5], (9 * hidden, C), jnp.float32),
        "b3": jnp.zeros((C,), jnp.float32),
    }


if __name__ == "__main__":
    B, C, H, W = 2, 4, 16, 16
    hidden = 32

    key = jax.random.PRNGKey(0)
    kp, kx = jax.random.split(key)
    params = make_params(kp, C, hidden)

    x = jax.random.normal(kx, (B, C, H, W), jnp.float32)   # NCHW, like PyTorch
    logdet0 = jnp.zeros((B,), jnp.float32)

    spb = default_samples_per_block(B)
    prepped = prepare_flow_step(params, H, W, spb)         # once per param set
    fwd = jax.jit(functools.partial(flow_step_forward, samples_per_block=spb))

    z, logdet = fwd(prepped, x, None, logdet0)
    z, logdet = jax.block_until_ready((z, logdet))

    z_ref, logdet_ref = reference_forward(params, x, logdet0)
    assert z.shape == (B, C, H, W) and logdet.shape == (B,)
    assert jnp.allclose(z, z_ref, atol=2e-4, rtol=2e-4), "z mismatch vs reference"
    assert jnp.allclose(logdet, logdet_ref, atol=1e-3, rtol=1e-3), "logdet mismatch"

    print("KERNEL_OK")
</pallas_src>

<mosaic_0001>
module attributes {stable_mosaic.version = 11 : i64} {
  func.func @_flow_step_kernel(%arg0: i32, %arg1: memref<4x256xf32, #tpu.memory_space<vmem>>, %arg2: memref<9x1x256xf32, #tpu.memory_space<vmem>>, %arg3: memref<8x4xf32, #tpu.memory_space<vmem>>, %arg4: memref<8x1xf32, #tpu.memory_space<vmem>>, %arg5: memref<32x72xf32, #tpu.memory_space<vmem>>, %arg6: memref<32x1xf32, #tpu.memory_space<vmem>>, %arg7: memref<32x32xf32, #tpu.memory_space<vmem>>, %arg8: memref<32x1xf32, #tpu.memory_space<vmem>>, %arg9: memref<8x288xf32, #tpu.memory_space<vmem>>, %arg10: memref<8x1xf32, #tpu.memory_space<vmem>>, %arg11: memref<4x256xf32, #tpu.memory_space<vmem>>, %arg12: memref<1x256xf32, #tpu.memory_space<vmem>>) attributes {dimension_semantics = [#tpu.dimension_semantics<parallel>], iteration_bounds = array<i64: 2>, scalar_prefetch = 0 : i64, scratch_operands = 0 : i64, tpu.core_type = #tpu.core_type<tc>, window_params = [{transform_indices = @transform_0, window_bounds = array<i64: 4, 256>}, {pipeline_mode = #tpu.pipeline_mode<synchronous>, transform_indices = @transform_1, window_bounds = array<i64: 9, 1, 256>}, {pipeline_mode = #tpu.pipeline_mode<synchronous>, transform_indices = @transform_2, window_bounds = array<i64: 8, 4>}, {pipeline_mode = #tpu.pipeline_mode<synchronous>, transform_indices = @transform_3, window_bounds = array<i64: 8, 1>}, {pipeline_mode = #tpu.pipeline_mode<synchronous>, transform_indices = @transform_4, window_bounds = array<i64: 32, 72>}, {pipeline_mode = #tpu.pipeline_mode<synchronous>, transform_indices = @transform_5, window_bounds = array<i64: 32, 1>}, {pipeline_mode = #tpu.pipeline_mode<synchronous>, transform_indices = @transform_6, window_bounds = array<i64: 32, 32>}, {pipeline_mode = #tpu.pipeline_mode<synchronous>, transform_indices = @transform_7, window_bounds = array<i64: 32, 1>}, {pipeline_mode = #tpu.pipeline_mode<synchronous>, transform_indices = @transform_8, window_bounds = array<i64: 8, 288>}, {pipeline_mode = #tpu.pipeline_mode<synchronous>, transform_indices = @transform_9, window_bounds = array<i64: 8, 1>}, {transform_indices = @transform_10, window_bounds = array<i64: 4, 256>}, {transform_indices = @transform_11, window_bounds = array<i64: 1, 256>}]} {
    %c0 = arith.constant 0 : index
    %c0_0 = arith.constant 0 : index
    %0 = vector.load %arg1[%c0, %c0_0] : memref<4x256xf32, #tpu.memory_space<vmem>>, vector<4x256xf32>
    %c0_1 = arith.constant 0 : index
    %c0_2 = arith.constant 0 : index
    %c0_3 = arith.constant 0 : index
    %1 = vector.load %arg2[%c0_1, %c0_2, %c0_3] : memref<9x1x256xf32, #tpu.memory_space<vmem>>, vector<9x1x256xf32>
    %c0_4 = arith.constant 0 : index
    %c0_5 = arith.constant 0 : index
    %2 = vector.load %arg3[%c0_4, %c0_5] : memref<8x4xf32, #tpu.memory_space<vmem>>, vector<8x4xf32>
    %cst = arith.constant dense<0.000000e+00> : vector<8x256xf32>
    %3 = tpu.matmul %2, %0, %cst {dimension_numbers = #tpu.dot_dimension_numbers<[1], [0], [0], [1], [0, 0, 1, 1], [], []>} : vector<8x4xf32>, vector<4x256xf32>, vector<8x256xf32> -> vector<8x256xf32>
    %c0_6 = arith.constant 0 : index
    %c0_7 = arith.constant 0 : index
    %4 = vector.load %arg4[%c0_6, %c0_7] : memref<8x1xf32, #tpu.memory_space<vmem>>, vector<8x1xf32>
    %5 = vector.broadcast %4 : vector<8x1xf32> to vector<8x256xf32>
    %6 = arith.addf %3, %5 : vector<8x256xf32>
    %7 = vector.extract_strided_slice %6 {offsets = [0, 0], sizes = [4, 256], strides = [1, 1]} : vector<8x256xf32> to vector<4x256xf32>
    %c0_8 = arith.constant 0 : index
    %c0_9 = arith.constant 0 : index
    %8 = vector.load %arg5[%c0_8, %c0_9] : memref<32x72xf32, #tpu.memory_space<vmem>>, vector<32x72xf32>
    %c17_i32 = arith.constant 17 : i32
    %9 = tpu.dynamic_rotate %6 by %c17_i32 dim 1 : vector<8x256xf32>, i32 -> vector<8x256xf32>
    %10 = vector.extract_strided_slice %1 {offsets = [0, 0, 0], sizes = [1, 1, 256], strides = [1, 1, 1]} : vector<9x1x256xf32> to vector<1x1x256xf32>
    %11 = vector.shape_cast %10 : vector<1x1x256xf32> to vector<1x256xf32>
    %12 = vector.broadcast %11 : vector<1x256xf32> to vector<8x256xf32>
    %13 = arith.mulf %9, %12 : vector<8x256xf32>
    %c16_i32 = arith.constant 16 : i32
    %14 = tpu.dynamic_rotate %6 by %c16_i32 dim 1 : vector<8x256xf32>, i32 -> vector<8x256xf32>
    %15 = vector.extract_strided_slice %1 {offsets = [1, 0, 0], sizes = [1, 1, 256], strides = [1, 1, 1]} : vector<9x1x256xf32> to vector<1x1x256xf32>
    %16 = vector.shape_cast %15 : vector<1x1x256xf32> to vector<1x256xf32>
    %17 = vector.broadcast %16 : vector<1x256xf32> to vector<8x256xf32>
    %18 = arith.mulf %14, %17 : vector<8x256xf32>
    %c15_i32 = arith.constant 15 : i32
    %19 = tpu.dynamic_rotate %6 by %c15_i32 dim 1 : vector<8x256xf32>, i32 -> vector<8x256xf32>
    %20 = vector.extract_strided_slice %1 {offsets = [2, 0, 0], sizes = [1, 1, 256], strides = [1, 1, 1]} : vector<9x1x256xf32> to vector<1x1x256xf32>
    %21 = vector.shape_cast %20 : vector<1x1x256xf32> to vector<1x256xf32>
    %22 = vector.broadcast %21 : vector<1x256xf32> to vector<8x256xf32>
    %23 = arith.mulf %19, %22 : vector<8x256xf32>
    %c1_i32 = arith.constant 1 : i32
    %24 = tpu.dynamic_rotate %6 by %c1_i32 dim 1 : vector<8x256xf32>, i32 -> vector<8x256xf32>
    %25 = vector.extract_strided_slice %1 {offsets = [3, 0, 0], sizes = [1, 1, 256], strides = [1, 1, 1]} : vector<9x1x256xf32> to vector<1x1x256xf32>
    %26 = vector.shape_cast %25 : vector<1x1x256xf32> to vector<1x256xf32>
    %27 = vector.broadcast %26 : vector<1x256xf32> to vector<8x256xf32>
    %28 = arith.mulf %24, %27 : vector<8x256xf32>
    %c255_i32 = arith.constant 255 : i32
    %29 = tpu.dynamic_rotate %6 by %c255_i32 dim 1 : vector<8x256xf32>, i32 -> vector<8x256xf32>
    %30 = vector.extract_strided_slice %1 {offsets = [5, 0, 0], sizes = [1, 1, 256], strides = [1, 1, 1]} : vector<9x1x256xf32> to vector<1x1x256xf32>
    %31 = vector.shape_cast %30 : vector<1x1x256xf32> to vector<1x256xf32>
    %32 = vector.broadcast %31 : vector<1x256xf32> to vector<8x256xf32>
    %33 = arith.mulf %29, %32 : vector<8x256xf32>
    %c241_i32 = arith.constant 241 : i32
    %34 = tpu.dynamic_rotate %6 by %c241_i32 dim 1 : vector<8x256xf32>, i32 -> vector<8x256xf32>
    %35 = vector.extract_strided_slice %1 {offsets = [6, 0, 0], sizes = [1, 1, 256], strides = [1, 1, 1]} : vector<9x1x256xf32> to vector<1x1x256xf32>
    %36 = vector.shape_cast %35 : vector<1x1x256xf32> to vector<1x256xf32>
    %37 = vector.broadcast %36 : vector<1x256xf32> to vector<8x256xf32>
    %38 = arith.mulf %34, %37 : vector<8x256xf32>
    %c240_i32 = arith.constant 240 : i32
    %39 = tpu.dynamic_rotate %6 by %c240_i32 dim 1 : vector<8x256xf32>, i32 -> vector<8x256xf32>
    %40 = vector.extract_strided_slice %1 {offsets = [7, 0, 0], sizes = [1, 1, 256], strides = [1, 1, 1]} : vector<9x1x256xf32> to vector<1x1x256xf32>
    %41 = vector.shape_cast %40 : vector<1x1x256xf32> to vector<1x256xf32>
    %42 = vector.broadcast %41 : vector<1x256xf32> to vector<8x256xf32>
    %43 = arith.mulf %39, %42 : vector<8x256xf32>
    %c239_i32 = arith.constant 239 : i32
    %44 = tpu.dynamic_rotate %6 by %c239_i32 dim 1 : vector<8x256xf32>, i32 -> vector<8x256xf32>
    %45 = vector.extract_strided_slice %1 {offsets = [8, 0, 0], sizes = [1, 1, 256], strides = [1, 1, 1]} : vector<9x1x256xf32> to vector<1x1x256xf32>
    %46 = vector.shape_cast %45 : vector<1x1x256xf32> to vector<1x256xf32>
    %47 = vector.broadcast %46 : vector<1x256xf32> to vector<8x256xf32>
    %48 = arith.mulf %44, %47 : vector<8x256xf32>
    %49 = tpu.concatenate %13, %18, %23, %28, %6, %33, %38, %43, %48 in 0 : vector<8x256xf32>, vector<8x256xf32>, vector<8x256xf32>, vector<8x256xf32>, vector<8x256xf32>, vector<8x256xf32>, vector<8x256xf32>, vector<8x256xf32>, vector<8x256xf32> -> vector<72x256xf32>
    %cst_10 = arith.constant dense<0.000000e+00> : vector<32x256xf32>
    %50 = tpu.matmul %8, %49, %cst_10 {dimension_numbers = #tpu.dot_dimension_numbers<[1], [0], [0], [1], [0, 0, 1, 1], [], []>} : vector<32x72xf32>, vector<72x256xf32>, vector<32x256xf32> -> vector<32x256xf32>
    %c0_11 = arith.constant 0 : index
    %c0_12 = arith.constant 0 : index
    %51 = vector.load %arg6[%c0_11, %c0_12] : memref<32x1xf32, #tpu.memory_space<vmem>>, vector<32x1xf32>
    %52 = vector.broadcast %51 : vector<32x1xf32> to vector<32x256xf32>
    %53 = arith.addf %50, %52 : vector<32x256xf32>
    %cst_13 = arith.constant 0.000000e+00 : f32
    %54 = vector.broadcast %cst_13 : f32 to vector<32x256xf32>
    %55 = arith.maximumf %53, %54 : vector<32x256xf32>
    %c0_14 = arith.constant 0 : index
    %c0_15 = arith.constant 0 : index
    %56 = vector.load %arg7[%c0_14, %c0_15] : memref<32x32xf32, #tpu.memory_space<vmem>>, vector<32x32xf32>
    %cst_16 = arith.constant dense<0.000000e+00> : vector<32x256xf32>
    %57 = tpu.matmul %56, %55, %cst_16 {dimension_numbers = #tpu.dot_dimension_numbers<[1], [0], [0], [1], [0, 0, 1, 1], [], []>} : vector<32x32xf32>, vector<32x256xf32>, vector<32x256xf32> -> vector<32x256xf32>
    %c0_17 = arith.constant 0 : index
    %c0_18 = arith.constant 0 : index
    %58 = vector.load %arg8[%c0_17, %c0_18] : memref<32x1xf32, #tpu.memory_space<vmem>>, vector<32x1xf32>
    %59 = vector.broadcast %58 : vector<32x1xf32> to vector<32x256xf32>
    %60 = arith.addf %57, %59 : vector<32x256xf32>
    %cst_19 = arith.constant 0.000000e+00 : f32
    %61 = vector.broadcast %cst_19 : f32 to vector<32x256xf32>
    %62 = arith.maximumf %60, %61 : vector<32x256xf32>
    %c0_20 = arith.constant 0 : index
    %c0_21 = arith.constant 0 : index
    %63 = vector.load %arg9[%c0_20, %c0_21] : memref<8x288xf32, #tpu.memory_space<vmem>>, vector<8x288xf32>
    %c17_i32_22 = arith.constant 17 : i32
    %64 = tpu.dynamic_rotate %62 by %c17_i32_22 dim 1 : vector<32x256xf32>, i32 -> vector<32x256xf32>
    %65 = vector.extract_strided_slice %1 {offsets = [0, 0, 0], sizes = [1, 1, 256], strides = [1, 1, 1]} : vector<9x1x256xf32> to vector<1x1x256xf32>
    %66 = vector.shape_cast %65 : vector<1x1x256xf32> to vector<1x256xf32>
    %67 = vector.broadcast %66 : vector<1x256xf32> to vector<32x256xf32>
    %68 = arith.mulf %64, %67 : vector<32x256xf32>
    %c16_i32_23 = arith.constant 16 : i32
    %69 = tpu.dynamic_rotate %62 by %c16_i32_23 dim 1 : vector<32x256xf32>, i32 -> vector<32x256xf32>
    %70 = vector.extract_strided_slice %1 {offsets = [1, 0, 0], sizes = [1, 1, 256], strides = [1, 1, 1]} : vector<9x1x256xf32> to vector<1x1x256xf32>
    %71 = vector.shape_cast %70 : vector<1x1x256xf32> to vector<1x256xf32>
    %72 = vector.broadcast %71 : vector<1x256xf32> to vector<32x256xf32>
    %73 = arith.mulf %69, %72 : vector<32x256xf32>
    %c15_i32_24 = arith.constant 15 : i32
    %74 = tpu.dynamic_rotate %62 by %c15_i32_24 dim 1 : vector<32x256xf32>, i32 -> vector<32x256xf32>
    %75 = vector.extract_strided_slice %1 {offsets = [2, 0, 0], sizes = [1, 1, 256], strides = [1, 1, 1]} : vector<9x1x256xf32> to vector<1x1x256xf32>
    %76 = vector.shape_cast %75 : vector<1x1x256xf32> to vector<1x256xf32>
    %77 = vector.broadcast %76 : vector<1x256xf32> to vector<32x256xf32>
    %78 = arith.mulf %74, %77 : vector<32x256xf32>
    %c1_i32_25 = arith.constant 1 : i32
    %79 = tpu.dynamic_rotate %62 by %c1_i32_25 dim 1 : vector<32x256xf32>, i32 -> vector<32x256xf32>
    %80 = vector.extract_strided_slice %1 {offsets = [3, 0, 0], sizes = [1, 1, 256], strides = [1, 1, 1]} : vector<9x1x256xf32> to vector<1x1x256xf32>
    %81 = vector.shape_cast %80 : vector<1x1x256xf32> to vector<1x256xf32>
    %82 = vector.broadcast %81 : vector<1x256xf32> to vector<32x256xf32>
    %83 = arith.mulf %79, %82 : vector<32x256xf32>
    %c255_i32_26 = arith.constant 255 : i32
    %84 = tpu.dynamic_rotate %62 by %c255_i32_26 dim 1 : vector<32x256xf32>, i32 -> vector<32x256xf32>
    %85 = vector.extract_strided_slice %1 {offsets = [5, 0, 0], sizes = [1, 1, 256], strides = [1, 1, 1]} : vector<9x1x256xf32> to vector<1x1x256xf32>
    %86 = vector.shape_cast %85 : vector<1x1x256xf32> to vector<1x256xf32>
    %87 = vector.broadcast %86 : vector<1x256xf32> to vector<32x256xf32>
    %88 = arith.mulf %84, %87 : vector<32x256xf32>
    %c241_i32_27 = arith.constant 241 : i32
    %89 = tpu.dynamic_rotate %62 by %c241_i32_27 dim 1 : vector<32x256xf32>, i32 -> vector<32x256xf32>
    %90 = vector.extract_strided_slice %1 {offsets = [6, 0, 0], sizes = [1, 1, 256], strides = [1, 1, 1]} : vector<9x1x256xf32> to vector<1x1x256xf32>
    %91 = vector.shape_cast %90 : vector<1x1x256xf32> to vector<1x256xf32>
    %92 = vector.broadcast %91 : vector<1x256xf32> to vector<32x256xf32>
    %93 = arith.mulf %89, %92 : vector<32x256xf32>
    %c240_i32_28 = arith.constant 240 : i32
    %94 = tpu.dynamic_rotate %62 by %c240_i32_28 dim 1 : vector<32x256xf32>, i32 -> vector<32x256xf32>
    %95 = vector.extract_strided_slice %1 {offsets = [7, 0, 0], sizes = [1, 1, 256], strides = [1, 1, 1]} : vector<9x1x256xf32> to vector<1x1x256xf32>
    %96 = vector.shape_cast %95 : vector<1x1x256xf32> to vector<1x256xf32>
    %97 = vector.broadcast %96 : vector<1x256xf32> to vector<32x256xf32>
    %98 = arith.mulf %94, %97 : vector<32x256xf32>
    %c239_i32_29 = arith.constant 239 : i32
    %99 = tpu.dynamic_rotate %62 by %c239_i32_29 dim 1 : vector<32x256xf32>, i32 -> vector<32x256xf32>
    %100 = vector.extract_strided_slice %1 {offsets = [8, 0, 0], sizes = [1, 1, 256], strides = [1, 1, 1]} : vector<9x1x256xf32> to vector<1x1x256xf32>
    %101 = vector.shape_cast %100 : vector<1x1x256xf32> to vector<1x256xf32>
    %102 = vector.broadcast %101 : vector<1x256xf32> to vector<32x256xf32>
    %103 = arith.mulf %99, %102 : vector<32x256xf32>
    %104 = tpu.concatenate %68, %73, %78, %83, %62, %88, %93, %98, %103 in 0 : vector<32x256xf32>, vector<32x256xf32>, vector<32x256xf32>, vector<32x256xf32>, vector<32x256xf32>, vector<32x256xf32>, vector<32x256xf32>, vector<32x256xf32>, vector<32x256xf32> -> vector<288x256xf32>
    %cst_30 = arith.constant dense<0.000000e+00> : vector<8x256xf32>
    %105 = tpu.matmul %63, %104, %cst_30 {dimension_numbers = #tpu.dot_dimension_numbers<[1], [0], [0], [1], [0, 0, 1, 1], [], []>} : vector<8x288xf32>, vector<288x256xf32>, vector<8x256xf32> -> vector<8x256xf32>
    %c0_31 = arith.constant 0 : index
    %c0_32 = arith.constant 0 : index
    %106 = vector.load %arg10[%c0_31, %c0_32] : memref<8x1xf32, #tpu.memory_space<vmem>>, vector<8x1xf32>
    %107 = vector.broadcast %106 : vector<8x1xf32> to vector<8x256xf32>
    %108 = arith.addf %105, %107 : vector<8x256xf32>
    %109 = vector.extract_strided_slice %108 {offsets = [0, 0], sizes = [4, 256], strides = [1, 1]} : vector<8x256xf32> to vector<4x256xf32>
    %110 = vector.extract_strided_slice %108 {offsets = [4, 0], sizes = [4, 256], strides = [1, 1]} : vector<8x256xf32> to vector<4x256xf32>
    %cst_33 = arith.constant 2.000000e+00 : f32
    %111 = vector.broadcast %cst_33 : f32 to vector<4x256xf32>
    %112 = arith.addf %110, %111 : vector<4x256xf32>
    %113 = arith.negf %112 : vector<4x256xf32>
    %114 = math.exp %113 : vector<4x256xf32>
    %cst_34 = arith.constant 1.000000e+00 : f32
    %115 = vector.broadcast %cst_34 : f32 to vector<4x256xf32>
    %116 = arith.addf %115, %114 : vector<4x256xf32>
    %117 = arith.divf %115, %116 : vector<4x256xf32>
    %118 = tpu.iota {dimensions = array<i32: 0>} : vector<4x256xi32>
    %c2_i32 = arith.constant 2 : i32
    %119 = vector.broadcast %c2_i32 : i32 to vector<4x256xi32>
    %120 = arith.cmpi slt, %118, %119 : vector<4x256xi32>
    %121 = arith.addf %7, %109 : vector<4x256xf32>
    %122 = arith.mulf %121, %117 : vector<4x256xf32>
    %123 = arith.select %120, %7, %122 : vector<4x256xi1>, vector<4x256xf32>
    %c0_35 = arith.constant 0 : index
    %c0_36 = arith.constant 0 : index
    %124 = vector.load %arg11[%c0_35, %c0_36] : memref<4x256xf32, #tpu.memory_space<vmem>>, vector<4x256xf32>
    tpu.vector_store %arg11[%c0_35, %c0_36], %123 {strides = array<i32>} : memref<4x256xf32, #tpu.memory_space<vmem>>, vector<4x256xf32>,
    %cst_37 = arith.constant 0.000000e+00 : f32
    %125 = vector.broadcast %cst_37 : f32 to vector<4x256xf32>
    %126 = arith.minimumf %112, %125 : vector<4x256xf32>
    %127 = math.absf %112 : vector<4x256xf32>
    %cst_38 = arith.constant 0.000000e+00 : f32
    %128 = vector.broadcast %cst_38 : f32 to vector<4x256xf32>
    %129 = arith.subf %128, %127 : vector<4x256xf32>
    %130 = math.exp %129 : vector<4x256xf32>
    %cst_39 = arith.constant 1.000000e+00 : f32
    %131 = vector.broadcast %cst_39 : f32 to vector<4x256xf32>
    %132 = arith.addf %131, %130 : vector<4x256xf32>
    %133 = math.log %132 : vector<4x256xf32>
    %134 = arith.subf %126, %133 : vector<4x256xf32>
    %cst_40 = arith.constant 0.000000e+00 : f32
    %135 = vector.broadcast %cst_40 : f32 to vector<4x256xf32>
    %136 = arith.select %120, %135, %134 : vector<4x256xi1>, vector<4x256xf32>
    %cst_41 = arith.constant dense<0.000000e+00> : vector<256xf32>
    %137 = vector.multi_reduction <add>, %136, %cst_41 [0] : vector<4x256xf32> to vector<256xf32>
    %138 = vector.shape_cast %137 : vector<256xf32> to vector<1x256xf32>
    %c0_42 = arith.constant 0 : index
    %c0_43 = arith.constant 0 : index
    %139 = vector.load %arg12[%c0_42, %c0_43] : memref<1x256xf32, #tpu.memory_space<vmem>>, vector<1x256xf32>
    tpu.vector_store %arg12[%c0_42, %c0_43], %138 {strides = array<i32>} : memref<1x256xf32, #tpu.memory_space<vmem>>, vector<1x256xf32>,
    return
  }
  func.func @transform_0(%arg0: i32) -> (i32, i32) {
    %c0_i32 = arith.constant 0 : i32
    %c0_i32_0 = arith.constant 0 : i32
    return %c0_i32, %arg0 : i32, i32
  }
  func.func @transform_1(%arg0: i32) -> (i32, i32, i32) {
    %c0_i32 = arith.constant 0 : i32
    %c0_i32_0 = arith.constant 0 : i32
    %c0_i32_1 = arith.constant 0 : i32
    %c0_i32_2 = arith.constant 0 : i32
    return %c0_i32, %c0_i32_0, %c0_i32_1 : i32, i32, i32
  }
  func.func @transform_2(%arg0: i32) -> (i32, i32) {
    %c0_i32 = arith.constant 0 : i32
    %c0_i32_0 = arith.constant 0 : i32
    %c0_i32_1 = arith.constant 0 : i32
    return %c0_i32, %c0_i32_0 : i32, i32
  }
  func.func @transform_3(%arg0: i32) -> (i32, i32) {
    %c0_i32 = arith.constant 0 : i32
    %c0_i32_0 = arith.constant 0 : i32
    %c0_i32_1 = arith.constant 0 : i32
    return %c0_i32, %c0_i32_0 : i32, i32
  }
  func.func @transform_4(%arg0: i32) -> (i32, i32) {
    %c0_i32 = arith.constant 0 : i32
    %c0_i32_0 = arith.constant 0 : i32
    %c0_i32_1 = arith.constant 0 : i32
    return %c0_i32, %c0_i32_0 : i32, i32
  }
  func.func @transform_5(%arg0: i32) -> (i32, i32) {
    %c0_i32 = arith.constant 0 : i32
    %c0_i32_0 = arith.constant 0 : i32
    %c0_i32_1 = arith.constant 0 : i32
    return %c0_i32, %c0_i32_0 : i32, i32
  }
  func.func @transform_6(%arg0: i32) -> (i32, i32) {
    %c0_i32 = arith.constant 0 : i32
    %c0_i32_0 = arith.constant 0 : i32
    %c0_i32_1 = arith.constant 0 : i32
    return %c0_i32, %c0_i32_0 : i32, i32
  }
  func.func @transform_7(%arg0: i32) -> (i32, i32) {
    %c0_i32 = arith.constant 0 : i32
    %c0_i32_0 = arith.constant 0 : i32
    %c0_i32_1 = arith.constant 0 : i32
    return %c0_i32, %c0_i32_0 : i32, i32
  }
  func.func @transform_8(%arg0: i32) -> (i32, i32) {
    %c0_i32 = arith.constant 0 : i32
    %c0_i32_0 = arith.constant 0 : i32
    %c0_i32_1 = arith.constant 0 : i32
    return %c0_i32, %c0_i32_0 : i32, i32
  }
  func.func @transform_9(%arg0: i32) -> (i32, i32) {
    %c0_i32 = arith.constant 0 : i32
    %c0_i32_0 = arith.constant 0 : i32
    %c0_i32_1 = arith.constant 0 : i32
    return %c0_i32, %c0_i32_0 : i32, i32
  }
  func.func @transform_10(%arg0: i32) -> (i32, i32) {
    %c0_i32 = arith.constant 0 : i32
    %c0_i32_0 = arith.constant 0 : i32
    return %c0_i32, %arg0 : i32, i32
  }
  func.func @transform_11(%arg0: i32) -> (i32, i32) {
    %c0_i32 = arith.constant 0 : i32
    %c0_i32_0 = arith.constant 0 : i32
    return %c0_i32, %arg0 : i32, i32
  }
}

</mosaic_0001>

<bundles_post_ra>
// kernel: flow_step_forward.1
= control target key start
LH: loop header
LB: loop body
LE: loop exit
PB: predicated region body
PF: predicated region fallthrough
CT: control target
= control target key end

     0   :  { %s1532_s17 = smov 0   ;;  %s2287_s0 = inlined_call_operand.vmem [shape: f32[4,512], index: 0, kind: input, shape index: {}]   ;;  %s2288_s1 = inlined_call_operand.vmem [shape: f32[9,1,256], index: 1, kind: input, shape index: {}]   ;;  %s2289_s2 = inlined_call_operand.vmem [shape: f32[8,4], index: 2, kind: input, shape index: {}]   ;;  %s2290_s3 = inlined_call_operand.vmem [shape: f32[8,1], index: 3, kind: input, shape index: {}]   ;;  %s2291_s4 = inlined_call_operand.vmem [shape: f32[32,72], index: 4, kind: input, shape index: {}]   ;;  %s2292_s5 = inlined_call_operand.vmem [shape: f32[32,1], index: 5, kind: input, shape index: {}]   ;;  %s2293_s6 = inlined_call_operand.vmem [shape: f32[32,32], index: 6, kind: input, shape index: {}]   ;;  %s2294_s7 = inlined_call_operand.vmem [shape: f32[32,1], index: 7, kind: input, shape index: {}]   ;;  %s2295_s8 = inlined_call_operand.vmem [shape: f32[8,288], index: 8, kind: input, shape index: {}]   ;;  %s2296_s9 = inlined_call_operand.vmem [shape: f32[8,1], index: 9, kind: input, shape index: {}]   ;;  %s2297_s10 = inlined_call_operand.vmem [shape: f32[4,512], index: 10, kind: output, shape index: {0}]   ;;  %s2298_s11 = inlined_call_operand.vmem [shape: f32[1,512], index: 11, kind: output, shape index: {1}]  }
   0x1 LB: > { %s1383_s18 = sadd.s32 4294967295, %s1461_s17   ;;  %p1387_p0 = scmp.ge.s32.totalorder %s1461_s17, 1  ;;  %s1461_s17 = sphi %s1532_s17, %s22_s17  }
   0x2   : > { %p341_p1 = scmp.lt.s32.totalorder %s1461_s17, 3 }
   0x4   : > { %p342_p2 = pnand %p1387_p0, %p341_p1 }
   0x6   : > { %345 = sbr.rel (%p342_p2) target bundleno = 1075 (0x433), region = 60 }
   0xb   : > { %s1388_s19 = sshll.u32 %s1383_s18, 1  ;;  %v412_v0 = vld [vmem:[%s2290_s3] sm:$0xff]  ;;  %v1463_v1 = vmov 0   ;;  %vm426_vm0 = vcmask 1043456   ;;  %vm422_vm1 = vcmask 31744   ;;  %s1464_s28 = smov 112   ;;  %v2299_v14 = vlaneseq }
   0xc   : > { %p386_p3 = scmp.lt.s32.totalorder %s1388_s19, 3  ;;  %1436 = vset.pattern.permute.xlu0 %v1463_v1  ;;  %1438 = vset.pattern.permute.xlu1 %v1463_v1  ;;  %v411_v3 = vld [vmem:[%s2289_s2] sm:$0xff]  ;;  %s1465_s29 = smov 111   ;;  %v591_v11 = vld [vmem:[%s2292_s5 + $0x10] sm:$0xff]  ;;  %v699_v12 = vld [vmem:[%s2294_s7 + $0x18] sm:$0xff]  ;;  %vm613_vm10 = vcmask 588800  }
   0xd   : > { %415 = vperm.xlu0 %1436, %v412_v0   ;;  %1437 = vset.pattern.permute.xlu2 %v1463_v1  ;;  %s1466_s30 = smov 113   ;;  %s1467_s12 = smov 127   ;;  %v696_v13 = vld [vmem:[%s2294_s7] sm:$0xff]  ;;  %v1602_v16 = vand.u32 127, %v2299_v14  ;;  %v410_v17 = vld [vmem:[%s2288_s1 + $0x10] sm:$0x3] }
   0xe   : > { %s2357_s19 = smov (!%p386_p3, %s1388_s19), 3  ;;  %s1468_s13 = smov 1   ;;  %v1608_v18 = vperm.slane %v410_v17, 0  ;;  %v1610_v19 = vperm.slane %v410_v17, 1  ;;  %v409_v27 = vld [vmem:[%s2288_s1 + $0xe] sm:$0x3] }
   0xf   : > { %s1389_s22 = sshll.u32 %s2357_s19, 2  ;;  %s1469_s14 = smov 15   ;;  %vm579_vm2 = vcmp.lt.s32.totalorder %v1602_v16, 111  ;;  %v408_v28 = vld [vmem:[%s2288_s1 + $0xc] sm:$0x3]  ;;  %vm565_vm3 = vcmp.lt.s32.totalorder %v1602_v16, 112 }
  0x10   : > { %s389_s25 = scalar_lea.vmem %s2287_s0, %s1389_s22  ;;  %s1470_s15 = smov 16   ;;  %2319 = vst [vmem:[#allocation4_spill] sm:$0xff] %v1608_v18  ;;  %v1625_v29 = vperm.slane %v409_v27, 0  ;;  %v1627_v30 = vperm.slane %v409_v27, 1  ;;  %vm551_vm4 = vcmp.lt.s32.totalorder %v1602_v16, 113  ;;  %v1630_v32 = vperm.slane %v408_v28, 0 }
  0x11   : > { %v402_v2 = vld [vmem:[%s389_s25] sm:$0xff]  ;;  %s1471_s16 = smov 17   ;;  %2320 = vst [vmem:[#allocation5_spill] sm:$0xff] %v1610_v19  ;;  %v1632_v33 = vperm.slane %v408_v28, 1  ;;  %v407_v41 = vld [vmem:[%s2288_s1 + $0xa] sm:$0x3]  ;;  %s395_s21 = scalar_lea.vmem %s2297_s10, %s1389_s22 }
  0x12   : > { %419 = vst [vmem:[#allocation1] ss:$2 sm:$0xff] %v402_v2  ;;  %vm537_vm5 = vcmp.lt.s32.totalorder %v1602_v16, 127  ;;  %v1650_v45 = vperm.slane %v407_v41, 0  ;;  %v1652_v46 = vperm.slane %v407_v41, 1  ;;  %vm523_vm6 = vcmp.lt.s32.totalorder %v1602_v16, 1  ;;  %s400_s25 = scalar_lea.vmem %s2298_s11, %s2357_s19 }
  0x13   : > { %v406_v53 = vld [vmem:[%s2288_s1 + $0x6] sm:$0x3]  ;;  %v405_v54 = vld [vmem:[%s2288_s1 + $0x4] sm:$0x3]  ;;  %vm509_vm7 = vcmp.lt.s32.totalorder %v1602_v16, 15  ;;  %vm495_vm8 = vcmp.lt.s32.totalorder %v1602_v16, 16 }
  0x14   : > { %v1669_v56 = vperm.slane %v406_v53, 0  ;;  %v1671_v57 = vperm.slane %v406_v53, 1  ;;  %v1674_v59 = vperm.slane %v405_v54, 0  ;;  %v1676_v60 = vperm.slane %v405_v54, 1  ;;  %v473_v41 = vld [vmem:[%s2291_s4 + $0x10] sm:$0xff] }
  0x15   : > { %vm481_vm9 = vcmp.lt.s32.totalorder %v1602_v16, 17  ;;  %vm720_vm11 = vcmask 261120  }
  0x19   : > { %v420_v4 = vld.sshfl [vmem:[#allocation1] sm:$0xff pattern:$0x75316420]  ;;  %v421_v5 = vld.sshfl [vmem:[#allocation1 + $0x8] sm:$0xff pattern:$0x75316420] }
  0x1a   : > { %1393 = vmatpush.msk.msra.mxu0 %vm426_vm0, %v420_v4  ;;  %1395 = vmatpush.msk.msra.mxu1 %vm426_vm0, %v421_v5  ;;  %v404_v4 = vld [vmem:[%s2288_s1 + $0x2] sm:$0x3] }
  0x1b   : > { %1394 = vmatmul.msk.f32.vlgmr.msra.gmra.mxu0 %vm422_vm1, %v411_v3  ;;  %1396 = vmatmul.msk.f32.vlgmr.msra.gmra.mxu1 %vm422_vm1, %v411_v3 }
  0x7f   : > { %v416_v6 = vpop.permute.xlu0 %415 }
  0x98   : > { %v448_v7 = vpop.f32.mrf.mxu0  ;;  %v468_v8 = vpop.f32.mrf.mxu1 }
  0x99   : > { %v1556_v9 = vadd.f32 %v448_v7, %v416_v6  ;;  %v1558_v10 = vadd.f32 %v468_v8, %v416_v6  ;;  %v1694_v7 = vperm.slane %v404_v4, 0  ;;  %v1696_v8 = vperm.slane %v404_v4, 1 }
  0x9b   : > { %2317 = vst [vmem:[#allocation2_spill] sm:$0xff] %v1556_v9  ;;  %563 = vrot.lane.b32.xlu2 %v1558_v10, %s1464_s28  ;;  %577 = vrot.lane.b32.xlu1 %v1558_v10, %s1465_s29 }
  0x9c   : > { %2318 = vst [vmem:[#allocation3_spill] sm:$0xff] %v1558_v10  ;;  %575 = vrot.lane.b32.xlu0 %v1556_v9, %s1465_s29 }
  0xa3   : > { %547 = vrot.lane.b32.xlu2 %v1556_v9, %s1466_s30  ;;  %561 = vrot.lane.b32.xlu1 %v1556_v9, %s1464_s28 }
  0xa4   : > { %549 = vrot.lane.b32.xlu0 %v1558_v10, %s1466_s30 }
  0xab   : > { %535 = vrot.lane.b32.xlu2 %v1558_v10, %s1467_s12  ;;  %533 = vrot.lane.b32.xlu1 %v1556_v9, %s1467_s12 }
  0xac   : > { %519 = vrot.lane.b32.xlu0 %v1556_v9, %s1468_s13 }
  0xb3   : > { %505 = vrot.lane.b32.xlu2 %v1556_v9, %s1469_s14  ;;  %521 = vrot.lane.b32.xlu1 %v1558_v10, %s1468_s13 }
  0xb4   : > { %507 = vrot.lane.b32.xlu0 %v1558_v10, %s1469_s14 }
  0xbb   : > { %493 = vrot.lane.b32.xlu2 %v1558_v10, %s1470_s15  ;;  %491 = vrot.lane.b32.xlu1 %v1556_v9, %s1470_s15 }
  0xbc   : > { %475 = vrot.lane.b32.xlu0 %v1556_v9, %s1471_s16 }
  0xc3   : > { %477 = vrot.lane.b32.xlu1 %v1558_v10, %s1471_s16 }
  0xc4   : > { %605 = vperm.xlu0 %1436, %v591_v11  }
  0xcc   : > { %717 = vperm.xlu0 %1436, %v699_v12  }
  0xd4   : > { %702 = vperm.xlu0 %1436, %v696_v13  }
  0xf5   : > { %v564_v15 = vpop.permute.xlu2 %563 }
  0xfd   : > { %v548_v22 = vpop.permute.xlu2 %547 }
 0x105   : > { %v536_v42 = vpop.permute.xlu2 %535 }
 0x10d   : > { %v578_v20 = vpop.permute.xlu1 %577  ;;  %v506_v55 = vpop.permute.xlu2 %505 }
 0x10e   : > { %v576_v21 = vpop.permute.xlu0 %575 }
 0x10f   : > { %v580_v23 = vsel %vm579_vm2, %v576_v21, %v578_v20  ;;  %v581_v24 = vsel %vm579_vm2, %v578_v20, %v576_v21  ;;  %v403_v21 = vld [vmem:[%s2288_s1] sm:$0x3] }
 0x110   : > { %v587_v25 = vmul.f32 %v1608_v18, %v580_v23  ;;  %v588_v26 = vmul.f32 %v1610_v19, %v581_v24  ;;  %v592_v23 = vld [vmem:[%s2292_s5 + $0x18] sm:$0xff]  ;;  %v1714_v24 = vperm.slane %v403_v21, 0 }
 0x111   : > { %610 = vperm.xlu2 %1437, %v592_v23   ;;  %v694_v23 = vld [vmem:[%s2293_s6 + $0x10] sm:$0xff] }
 0x112   : > { %633 = vmatpush.msra.mxu2 %v587_v25  ;;  %662 = vmatpush.msra.mxu3 %v588_v26  ;;  %v1716_v25 = vperm.slane %v403_v21, 1  ;;  %v692_v21 = vld [vmem:[%s2293_s6] sm:$0xff] }
 0x115   : > { %v562_v31 = vpop.permute.xlu1 %561  ;;  %v494_v11 = vpop.permute.xlu2 %493 }
 0x116   : > { %v566_v34 = vsel %vm565_vm3, %v562_v31, %v564_v15  ;;  %v567_v35 = vsel %vm565_vm3, %v564_v15, %v562_v31  ;;  %v550_v36 = vpop.permute.xlu0 %549 }
 0x117   : > { %v552_v37 = vsel %vm551_vm4, %v548_v22, %v550_v36  ;;  %v553_v38 = vsel %vm551_vm4, %v550_v36, %v548_v22  ;;  %v573_v39 = vmul.f32 %v1625_v29, %v566_v34  ;;  %v574_v40 = vmul.f32 %v1627_v30, %v567_v35  ;;  %v590_v22 = vld [vmem:[%s2292_s5 + $0x8] sm:$0xff]  ;;  %v471_v36 = vld [vmem:[%s2291_s4] sm:$0xff] }
 0x118   : > { %v559_v43 = vmul.f32 %v1630_v32, %v552_v37  ;;  %v560_v44 = vmul.f32 %v1632_v33, %v553_v38  ;;  %600 = vperm.xlu1 %1438, %v590_v22   ;;  %v589_v37 = vld [vmem:[%s2292_s5] sm:$0xff]  ;;  %v698_v38 = vld [vmem:[%s2294_s7 + $0x10] sm:$0xff]  ;;  %v693_v22 = vld [vmem:[%s2293_s6 + $0x8] sm:$0xff] }
 0x119   : > { %634 = vmatpush.msra.mxu2 %v573_v39  ;;  %663 = vmatpush.msra.mxu3 %v574_v40  ;;  %v472_v39 = vld [vmem:[%s2291_s4 + $0x8] sm:$0xff] }
 0x11a   : > { %595 = vperm.xlu2 %1437, %v589_v37   ;;  %v697_v40 = vld [vmem:[%s2294_s7 + $0x8] sm:$0xff] }
 0x11b   : > { %635 = vmatpush.msra.mxu2 %v559_v43  ;;  %664 = vmatpush.msra.mxu3 %v560_v44 }
 0x11d   : > { %v534_v47 = vpop.permute.xlu1 %533 }
 0x11e   : > { %v538_v48 = vsel %vm537_vm5, %v534_v47, %v536_v42  ;;  %v539_v49 = vsel %vm537_vm5, %v536_v42, %v534_v47  ;;  %v520_v50 = vpop.permute.xlu0 %519  ;;  %v474_v42 = vld [vmem:[%s2291_s4 + $0x18] sm:$0xff] }
 0x11f   : > { %v545_v51 = vmul.f32 %v1650_v45, %v538_v48  ;;  %v546_v52 = vmul.f32 %v1652_v46, %v539_v49 }
 0x120   : > { %712 = vperm.xlu1 %1438, %v698_v38  }
 0x121   : > { %636 = vmatpush.msra.mxu2 %v545_v51  ;;  %665 = vmatpush.msra.mxu3 %v546_v52 }
 0x122   : > { %707 = vperm.xlu2 %1437, %v697_v40  }
 0x123   : > { %637 = vmatpush.msra.mxu2 %v1556_v9  ;;  %666 = vmatpush.msra.mxu3 %v1558_v10 }
 0x125   : > { %v522_v58 = vpop.permute.xlu1 %521 }
 0x126   : > { %v524_v61 = vsel %vm523_vm6, %v520_v50, %v522_v58  ;;  %v525_v62 = vsel %vm523_vm6, %v522_v58, %v520_v50  ;;  %v508_v63 = vpop.permute.xlu0 %507 }
 0x127   : > { %v510_v0 = vsel %vm509_vm7, %v506_v55, %v508_v63  ;;  %v511_v1 = vsel %vm509_vm7, %v508_v63, %v506_v55  ;;  %v531_v2 = vmul.f32 %v1669_v56, %v525_v62  ;;  %v532_v3 = vmul.f32 %v1671_v57, %v524_v61 }
 0x128   : > { %v517_v5 = vmul.f32 %v1674_v59, %v511_v1  ;;  %v518_v6 = vmul.f32 %v1676_v60, %v510_v0 }
 0x129   : > { %638 = vmatpush.msra.mxu2 %v531_v2  ;;  %667 = vmatpush.msra.mxu3 %v532_v3 }
 0x12b   : > { %639 = vmatpush.msra.mxu2 %v517_v5  ;;  %668 = vmatpush.msra.mxu3 %v518_v6 }
 0x12d   : > { %v492_v12 = vpop.permute.xlu1 %491 }
 0x12e   : > { %v496_v13 = vsel %vm495_vm8, %v492_v12, %v494_v11  ;;  %v497_v15 = vsel %vm495_vm8, %v494_v11, %v492_v12  ;;  %v476_v26 = vpop.permute.xlu0 %475 }
 0x12f   : > { %v503_v17 = vmul.f32 %v1694_v7, %v497_v15  ;;  %v504_v20 = vmul.f32 %v1696_v8, %v496_v13 }
 0x131   : > { %640 = vmatpush.msra.mxu2 %v503_v17  ;;  %669 = vmatpush.msra.mxu3 %v504_v20 }
 0x135   : > { %v478_v27 = vpop.permute.xlu1 %477 }
 0x136   : > { %v482_v28 = vsel %vm481_vm9, %v476_v26, %v478_v27  ;;  %v483_v31 = vsel %vm481_vm9, %v478_v27, %v476_v26  ;;  %v606_v52 = vpop.permute.xlu0 %605  ;;  %v695_v26 = vld [vmem:[%s2293_s6 + $0x18] sm:$0xff] }
 0x137   : > { %v489_v34 = vmul.f32 %v1714_v24, %v483_v31  ;;  %v490_v35 = vmul.f32 %v1716_v25, %v482_v28 }
 0x139   : > { %641 = vmatpush.msra.mxu2 %v489_v34  ;;  %670 = vmatpush.msra.mxu3 %v490_v35 }
 0x13a   : > { %1397 = vmatmul.msk.f32.vlgmr.msra.gmra.mxu2 %vm613_vm10, %v471_v36  ;;  %1401 = vmatmul.msk.f32.vlgmr.msra.gmra.mxu3 %vm613_vm10, %v471_v36 }
 0x13e   : > { %v1773_v27 = vpop.permute.xlu0 %717 }
 0x142   : > { %1398 = vmatmul.msk.f32.gmra.mxu2 %vm613_vm10, %v472_v39  ;;  %1402 = vmatmul.msk.f32.gmra.mxu3 %vm613_vm10, %v472_v39 }
 0x146   : > { %v703_v28 = vpop.permute.xlu0 %702 }
 0x14a   : > { %1399 = vmatmul.msk.f32.gmra.mxu2 %vm613_vm10, %v473_v41  ;;  %1403 = vmatmul.msk.f32.gmra.mxu3 %vm613_vm10, %v473_v41 }
 0x152   : > { %1400 = vmatmul.msk.f32.gmra.mxu2 %vm613_vm10, %v474_v42  ;;  %1404 = vmatmul.msk.f32.gmra.mxu3 %vm613_vm10, %v474_v42 }
 0x16b   : > { %v611_v49 = vpop.permute.xlu2 %610 }
 0x174   : > { %v596_v0 = vpop.permute.xlu2 %595 }
 0x17c   : > { %v708_v40 = vpop.permute.xlu2 %707 }
 0x18a   : > { %v601_v53 = vpop.permute.xlu1 %600 }
 0x1bd   : > { %v643_v43 = vpop.f32.mrf.mxu2  ;;  %v672_v44 = vpop.f32.mrf.mxu3 }
 0x1be   : > { %v644_v5 = vadd.f32 %v643_v43, %v596_v0  ;;  %v673_v6 = vadd.f32 %v672_v44, %v596_v0 }
 0x1c0   : > { %v684_v17 = vmax.f32 %v644_v5, 0.0  ;;  %v685_v20 = vmax.f32 %v673_v6, 0.0 }
 0x1c5   : > { %v646_v47 = vpop.f32.mrf.mxu2  ;;  %v675_v48 = vpop.f32.mrf.mxu3 }
 0x1c6   : > { %v647_v1 = vadd.f32 %v646_v47, %v601_v53  ;;  %v676_v2 = vadd.f32 %v675_v48, %v601_v53 }
 0x1c8   : > { %v686_v13 = vmax.f32 %v647_v1, 0.0  ;;  %v687_v15 = vmax.f32 %v676_v2, 0.0 }
 0x1cd   : > { %v649_v50 = vpop.f32.mrf.mxu2  ;;  %v678_v51 = vpop.f32.mrf.mxu3 }
 0x1ce   : > { %v650_v58 = vadd.f32 %v649_v50, %v606_v52  ;;  %v679_v61 = vadd.f32 %v678_v51, %v606_v52  ;;  %v713_v50 = vpop.permute.xlu1 %712 }
 0x1d0   : > { %v688_v11 = vmax.f32 %v650_v58, 0.0  ;;  %v689_v12 = vmax.f32 %v679_v61, 0.0 }
 0x1d5   : > { %v652_v54 = vpop.f32.mrf.mxu2  ;;  %v681_v55 = vpop.f32.mrf.mxu3 }
 0x1d6   : > { %v653_v62 = vadd.f32 %v652_v54, %v611_v49  ;;  %v682_v63 = vadd.f32 %v681_v55, %v611_v49 }
 0x1d8   : > { %v690_v3 = vmax.f32 %v653_v62, 0.0  ;;  %v691_v4 = vmax.f32 %v682_v63, 0.0 }
 0x1da   : > { %745 = vmatpush.msrb.mxu0 %v690_v3  ;;  %774 = vmatpush.msrb.mxu1 %v691_v4 }
 0x1dc   : > { %746 = vmatpush.msrb.mxu0 %v688_v11  ;;  %775 = vmatpush.msrb.mxu1 %v689_v12 }
 0x1de   : > { %747 = vmatpush.msrb.mxu0 %v686_v13  ;;  %776 = vmatpush.msrb.mxu1 %v687_v15 }
 0x1e0   : > { %748 = vmatpush.msrb.mxu0 %v684_v17  ;;  %777 = vmatpush.msrb.mxu1 %v685_v20 }
 0x1e1   : > { %1405 = vmatmul.msk.f32.vlgmr.msrb.gmra.mxu0 %vm720_vm11, %v692_v21  ;;  %1409 = vmatmul.msk.f32.vlgmr.msrb.gmra.mxu1 %vm720_vm11, %v692_v21 }
 0x1e9   : > { %1406 = vmatmul.msk.f32.gmra.mxu0 %vm720_vm11, %v693_v22  ;;  %1410 = vmatmul.msk.f32.gmra.mxu1 %vm720_vm11, %v693_v22 }
 0x1f1   : > { %1407 = vmatmul.msk.f32.gmra.mxu0 %vm720_vm11, %v694_v23  ;;  %1411 = vmatmul.msk.f32.gmra.mxu1 %vm720_vm11, %v694_v23 }
 0x1f9   : > { %1408 = vmatmul.msk.f32.gmra.mxu0 %vm720_vm11, %v695_v26  ;;  %1412 = vmatmul.msk.f32.gmra.mxu1 %vm720_vm11, %v695_v26 }
 0x25e   : > { %v750_v31 = vpop.f32.mrf.mxu0  ;;  %v779_v34 = vpop.f32.mrf.mxu1 }
 0x25f   : > { %v751_v35 = vadd.f32 %v750_v31, %v703_v28  ;;  %v780_v36 = vadd.f32 %v779_v34, %v703_v28 }
 0x261   : > { %v1775_v37 = vmax.f32 %v751_v35, 0.0  ;;  %v1777_v38 = vmax.f32 %v780_v36, 0.0 }
 0x263   : > { %2321 = vst [vmem:[#allocation6_spill] sm:$0xff] %v1775_v37  ;;  %874 = vrot.lane.b32.xlu1 %v1777_v38, %s1469_s14  ;;  %906 = vrot.lane.b32.xlu0 %v1777_v38, %s1468_s13 }
 0x264   : > { %2322 = vst [vmem:[#allocation7_spill] sm:$0xff] %v1777_v38  ;;  %898 = vrot.lane.b32.xlu2 %v1775_v37, %s1468_s13 }
 0x266   : > { %v782_v39 = vpop.f32.mrf.mxu1  ;;  %v753_v43 = vpop.f32.mrf.mxu0 }
 0x267   : > { %v783_v41 = vadd.f32 %v782_v39, %v708_v40  ;;  %v754_v44 = vadd.f32 %v753_v43, %v708_v40 }
 0x269   : > { %v1803_v42 = vmax.f32 %v783_v41, 0.0  ;;  %v1811_v47 = vmax.f32 %v754_v44, 0.0 }
 0x26b   : > { %970 = vrot.lane.b32.xlu1 %v1777_v38, %s1466_s30  ;;  %1002 = vrot.lane.b32.xlu0 %v1777_v38, %s1464_s28  ;;  %2323 = vst [vmem:[#allocation8_spill] sm:$0xff] %v1803_v42 }
 0x26c   : > { %994 = vrot.lane.b32.xlu2 %v1775_v37, %s1464_s28  ;;  %2324 = vst [vmem:[#allocation9_spill] sm:$0xff] %v1811_v47 }
 0x26e   : > { %v756_v48 = vpop.f32.mrf.mxu0  ;;  %v785_v49 = vpop.f32.mrf.mxu1 }
 0x26f   : > { %v757_v51 = vadd.f32 %v756_v48, %v713_v50  ;;  %v786_v52 = vadd.f32 %v785_v49, %v713_v50 }
 0x271   : > { %v1837_v53 = vmax.f32 %v757_v51, 0.0  ;;  %v1839_v54 = vmax.f32 %v786_v52, 0.0 }
 0x273   : > { %834 = vrot.lane.b32.xlu1 %v1775_v37, %s1470_s15  ;;  %866 = vrot.lane.b32.xlu0 %v1775_v37, %s1469_s14  ;;  %2325 = vst [vmem:[#allocation10_spill] sm:$0xff] %v1837_v53 }
 0x274   : > { %842 = vrot.lane.b32.xlu2 %v1777_v38, %s1470_s15  ;;  %2326 = vst [vmem:[#allocation11_spill] sm:$0xff] %v1839_v54 }
 0x276   : > { %v759_v61 = vpop.f32.mrf.mxu0  ;;  %v788_v62 = vpop.f32.mrf.mxu1 }
 0x277   : > { %v760_v63 = vadd.f32 %v759_v61, %v1773_v27  ;;  %v789_v0 = vadd.f32 %v788_v62, %v1773_v27 }
 0x279   : > { %v1873_v2 = vmax.f32 %v760_v63, 0.0  ;;  %v1875_v3 = vmax.f32 %v789_v0, 0.0 }
 0x27b   : > { %930 = vrot.lane.b32.xlu1 %v1775_v37, %s1467_s12  ;;  %962 = vrot.lane.b32.xlu0 %v1775_v37, %s1466_s30  ;;  %2327 = vst [vmem:[#allocation12_spill] sm:$0xff] %v1873_v2 }
 0x27c   : > { %938 = vrot.lane.b32.xlu2 %v1777_v38, %s1467_s12  ;;  %2328 = vst [vmem:[#allocation13_spill] sm:$0xff] %v1875_v3 }
 0x283   : > { %802 = vrot.lane.b32.xlu1 %v1775_v37, %s1471_s16  ;;  %876 = vrot.lane.b32.xlu0 %v1803_v42, %s1469_s14 }
 0x284   : > { %810 = vrot.lane.b32.xlu2 %v1777_v38, %s1471_s16 }
 0x28b   : > { %900 = vrot.lane.b32.xlu1 %v1811_v47, %s1468_s13  ;;  %972 = vrot.lane.b32.xlu0 %v1803_v42, %s1466_s30 }
 0x28c   : > { %908 = vrot.lane.b32.xlu2 %v1803_v42, %s1468_s13 }
 0x293   : > { %996 = vrot.lane.b32.xlu1 %v1811_v47, %s1464_s28  ;;  %836 = vrot.lane.b32.xlu0 %v1811_v47, %s1470_s15 }
 0x294   : > { %1004 = vrot.lane.b32.xlu2 %v1803_v42, %s1464_s28 }
 0x29b   : > { %844 = vrot.lane.b32.xlu1 %v1803_v42, %s1470_s15  ;;  %932 = vrot.lane.b32.xlu0 %v1811_v47, %s1467_s12 }
 0x29c   : > { %868 = vrot.lane.b32.xlu2 %v1811_v47, %s1469_s14 }
 0x2a3   : > { %940 = vrot.lane.b32.xlu1 %v1803_v42, %s1467_s12  ;;  %812 = vrot.lane.b32.xlu0 %v1803_v42, %s1471_s16 }
 0x2a4   : > { %964 = vrot.lane.b32.xlu2 %v1811_v47, %s1466_s30 }
 0x2ab   : > { %910 = vrot.lane.b32.xlu1 %v1839_v54, %s1468_s13  ;;  %902 = vrot.lane.b32.xlu0 %v1837_v53, %s1468_s13 }
 0x2ac   : > { %804 = vrot.lane.b32.xlu2 %v1811_v47, %s1471_s16 }
 0x2b3   : > { %1006 = vrot.lane.b32.xlu1 %v1839_v54, %s1464_s28  ;;  %998 = vrot.lane.b32.xlu0 %v1837_v53, %s1464_s28 }
 0x2b4   : > { %878 = vrot.lane.b32.xlu2 %v1839_v54, %s1469_s14 }
 0x2bb   : > { %870 = vrot.lane.b32.xlu1 %v1837_v53, %s1469_s14  ;;  %846 = vrot.lane.b32.xlu0 %v1839_v54, %s1470_s15 }
 0x2bc   : > { %974 = vrot.lane.b32.xlu2 %v1839_v54, %s1466_s30 }
 0x2be   : > { %v899_v55 = vpop.permute.xlu2 %898 }
 0x2c3   : > { %966 = vrot.lane.b32.xlu1 %v1837_v53, %s1466_s30  ;;  %942 = vrot.lane.b32.xlu0 %v1839_v54, %s1467_s12 }
 0x2c4   : > { %838 = vrot.lane.b32.xlu2 %v1837_v53, %s1470_s15 }
 0x2c6   : > { %v995_v58 = vpop.permute.xlu2 %994 }
 0x2cb   : > { %814 = vrot.lane.b32.xlu1 %v1839_v54, %s1471_s16  ;;  %806 = vrot.lane.b32.xlu0 %v1837_v53, %s1471_s16 }
 0x2cc   : > { %934 = vrot.lane.b32.xlu2 %v1837_v53, %s1467_s12 }
 0x2ce   : > { %v843_v1 = vpop.permute.xlu2 %842 }
 0x2d3   : > { %904 = vrot.lane.b32.xlu1 %v1873_v2, %s1468_s13  ;;  %1008 = vrot.lane.b32.xlu0 %v1875_v3, %s1464_s28 }
 0x2d4   : > { %912 = vrot.lane.b32.xlu2 %v1875_v3, %s1468_s13 }
 0x2d5   : > { %v875_v4 = vpop.permute.xlu1 %874  ;;  %v907_v5 = vpop.permute.xlu0 %906 }
 0x2d6   : > { %v1885_v6 = vsel %vm523_vm6, %v899_v55, %v907_v5  ;;  %v1889_v11 = vsel %vm523_vm6, %v907_v5, %v899_v55  ;;  %v939_v12 = vpop.permute.xlu2 %938 }
 0x2db   : > { %880 = vrot.lane.b32.xlu1 %v1875_v3, %s1469_s14  ;;  %872 = vrot.lane.b32.xlu0 %v1873_v2, %s1469_s14 }
 0x2dc   : > { %1000 = vrot.lane.b32.xlu2 %v1873_v2, %s1464_s28 }
 0x2dd   : > { %v971_v13 = vpop.permute.xlu1 %970  ;;  %v1003_v15 = vpop.permute.xlu0 %1002 }
 0x2de   : > { %v1899_v17 = vsel %vm565_vm3, %v995_v58, %v1003_v15  ;;  %v1903_v20 = vsel %vm565_vm3, %v1003_v15, %v995_v58  ;;  %v811_v21 = vpop.permute.xlu2 %810 }
 0x2e3   : > { %976 = vrot.lane.b32.xlu1 %v1875_v3, %s1466_s30  ;;  %968 = vrot.lane.b32.xlu0 %v1873_v2, %s1466_s30 }
 0x2e4   : > { %848 = vrot.lane.b32.xlu2 %v1875_v3, %s1470_s15 }
 0x2e5   : > { %v835_v22 = vpop.permute.xlu1 %834  ;;  %v867_v23 = vpop.permute.xlu0 %866 }
 0x2e6   : > { %v1913_v26 = vsel %vm495_vm8, %v835_v22, %v843_v1  ;;  %v1917_v27 = vsel %vm495_vm8, %v843_v1, %v835_v22  ;;  %v1921_v28 = vsel %vm509_vm7, %v867_v23, %v875_v4  ;;  %v1925_v31 = vsel %vm509_vm7, %v875_v4, %v867_v23  ;;  %v909_v34 = vpop.permute.xlu2 %908  ;;  %v1058_v23 = vld [vmem:[%s2296_s9] sm:$0xff] }
 0x2eb   : > { %840 = vrot.lane.b32.xlu1 %v1873_v2, %s1470_s15  ;;  %1038 = vrot.lane.b32.xlu0 %v1839_v54, %s1465_s29 }
 0x2ec   : > { %944 = vrot.lane.b32.xlu2 %v1875_v3, %s1467_s12 }
 0x2ed   : > { %v931_v35 = vpop.permute.xlu1 %930  ;;  %v963_v36 = vpop.permute.xlu0 %962 }
 0x2ee   : > { %v1935_v39 = vsel %vm537_vm5, %v931_v35, %v939_v12  ;;  %v1939_v40 = vsel %vm537_vm5, %v939_v12, %v931_v35  ;;  %v1943_v41 = vsel %vm551_vm4, %v963_v36, %v971_v13  ;;  %v1947_v43 = vsel %vm551_vm4, %v971_v13, %v963_v36  ;;  %v1005_v44 = vpop.permute.xlu2 %1004 }
 0x2ef   : > { %2329 = vst [vmem:[#allocation14_spill] sm:$0xff] %v1935_v39 }
 0x2f0   : > { %2330 = vst [vmem:[#allocation15_spill] sm:$0xff] %v1939_v40 }
 0x2f3   : > { %936 = vrot.lane.b32.xlu1 %v1873_v2, %s1467_s12  ;;  %816 = vrot.lane.b32.xlu0 %v1875_v3, %s1471_s16 }
 0x2f4   : > { %808 = vrot.lane.b32.xlu2 %v1873_v2, %s1471_s16 }
 0x2f5   : > { %v803_v48 = vpop.permute.xlu1 %802  ;;  %v877_v49 = vpop.permute.xlu0 %876 }
 0x2f6   : > { %v1957_v50 = vsel %vm481_vm9, %v803_v48, %v811_v21  ;;  %v1961_v51 = vsel %vm481_vm9, %v811_v21, %v803_v48  ;;  %v869_v52 = vpop.permute.xlu2 %868 }
 0x2f7   : > { %2331 = vst [vmem:[#allocation16_spill] sm:$0xff] %v1957_v50  ;;  %v1965_v55 = vsel %vm509_vm7, %v869_v52, %v877_v49  ;;  %v1969_v58 = vsel %vm509_vm7, %v877_v49, %v869_v52 }
 0x2f8   : > { %2332 = vst [vmem:[#allocation17_spill] sm:$0xff] %v1961_v51 }
 0x2fb   : > { %1028 = vrot.lane.b32.xlu1 %v1811_v47, %s1465_s29  ;;  %1032 = vrot.lane.b32.xlu0 %v1873_v2, %s1465_s29 }
 0x2fc   : > { %1030 = vrot.lane.b32.xlu2 %v1837_v53, %s1465_s29 }
 0x2fd   : > { %v901_v61 = vpop.permute.xlu1 %900  ;;  %v973_v62 = vpop.permute.xlu0 %972 }
 0x2fe   : > { %v1979_v63 = vsel %vm523_vm6, %v901_v61, %v909_v34  ;;  %v1983_v0 = vsel %vm523_vm6, %v909_v34, %v901_v61  ;;  %v965_v1 = vpop.permute.xlu2 %964 }
 0x2ff   : > { %v1987_v4 = vsel %vm551_vm4, %v965_v1, %v973_v62  ;;  %v1991_v5 = vsel %vm551_vm4, %v973_v62, %v965_v1 }
 0x303   : > { %1040 = vrot.lane.b32.xlu1 %v1875_v3, %s1465_s29  ;;  %1026 = vrot.lane.b32.xlu0 %v1775_v37, %s1465_s29 }
 0x304   : > { %1036 = vrot.lane.b32.xlu2 %v1803_v42, %s1465_s29 }
 0x305   : > { %v997_v12 = vpop.permute.xlu1 %996  ;;  %v837_v13 = vpop.permute.xlu0 %836 }
 0x306   : > { %v1011_v15 = vsel %vm565_vm3, %v997_v12, %v1005_v44  ;;  %v1015_v21 = vsel %vm565_vm3, %v1005_v44, %v997_v12  ;;  %v805_v22 = vpop.permute.xlu2 %804 }
 0x30b   : > { %1034 = vrot.lane.b32.xlu1 %v1777_v38, %s1465_s29 }
 0x30c   : > { %1061 = vperm.xlu2 %1437, %v1058_v23  }
 0x30d   : > { %v845_v34 = vpop.permute.xlu1 %844  ;;  %v933_v35 = vpop.permute.xlu0 %932 }
 0x30e   : > { %v2010_v36 = vsel %vm495_vm8, %v837_v13, %v845_v34  ;;  %v2014_v48 = vsel %vm495_vm8, %v845_v34, %v837_v13  ;;  %v2016_v44 = vpop.permute.xlu2 %878 }
 0x315   : > { %v941_v49 = vpop.permute.xlu1 %940  ;;  %v813_v52 = vpop.permute.xlu0 %812 }
 0x316   : > { %v2020_v61 = vsel %vm537_vm5, %v933_v35, %v941_v49  ;;  %v2024_v62 = vsel %vm537_vm5, %v941_v49, %v933_v35  ;;  %v2028_v1 = vsel %vm481_vm9, %v805_v22, %v813_v52  ;;  %v2032_v12 = vsel %vm481_vm9, %v813_v52, %v805_v22  ;;  %v2034_v13 = vpop.permute.xlu2 %974 }
 0x317   : > { %2333 = vst [vmem:[#allocation18_spill] sm:$0xff] %v2024_v62 }
 0x318   : > { %2334 = vst [vmem:[#allocation19_spill] sm:$0xff] %v2028_v1 }
 0x319   : > { %2335 = vst [vmem:[#allocation20_spill] sm:$0xff] %v2032_v12 }
 0x31d   : > { %v911_v23 = vpop.permute.xlu1 %910  ;;  %v903_v34 = vpop.permute.xlu0 %902 }
 0x31e   : > { %v2036_v9 = vpop.permute.xlu2 %838  ;;  %v916_v47 = vsel %vm523_vm6, %v903_v34, %v911_v23  ;;  %v920_v54 = vsel %vm523_vm6, %v911_v23, %v903_v34 }
 0x31f   : > { %v926_v1 = vmul.f32 %v920_v54, %v1669_v56  ;;  %v922_v54 = vmul.f32 %v1889_v11, %v1669_v56 }
 0x325   : > { %v1007_v14 = vpop.permute.xlu1 %1006  ;;  %v999_v10 = vpop.permute.xlu0 %998 }
 0x326   : > { %v2040_v35 = vpop.permute.xlu2 %934  ;;  %v1012_v53 = vsel %vm565_vm3, %v999_v10, %v1007_v14  ;;  %v1016_v3 = vsel %vm565_vm3, %v1007_v14, %v999_v10 }
 0x327   : > { %v1022_v12 = vmul.f32 %v1012_v53, %v1625_v29  ;;  %v925_v53 = vmul.f32 %v1979_v63, %v1671_v57 }
 0x32d   : > { %v871_v38 = vpop.permute.xlu1 %870  ;;  %v2038_v37 = vpop.permute.xlu0 %846 }
 0x32e   : > { %v913_v18 = vpop.permute.xlu2 %912  ;;  %v888_v11 = vsel %vm509_vm7, %v2016_v44, %v871_v38 }
 0x335   : > { %v2042_v49 = vpop.permute.xlu1 %966  ;;  %v2044_v19 = vpop.permute.xlu0 %942 }
 0x336   : > { %v1001_v42 = vpop.permute.xlu2 %1000 }
 0x33d   : > { %v2046_v22 = vpop.permute.xlu1 %814  ;;  %v2048_v52 = vpop.permute.xlu0 %806 }
 0x345   : > { %v905_v2 = vpop.permute.xlu1 %904  ;;  %v1009_v40 = vpop.permute.xlu0 %1008 }
 0x346   : > { %v917_v50 = vsel %vm523_vm6, %v905_v2, %v913_v18  ;;  %v921_v51 = vsel %vm523_vm6, %v913_v18, %v905_v2  ;;  %v1013_v39 = vsel %vm565_vm3, %v1001_v42, %v1009_v40  ;;  %v1017_v23 = vsel %vm565_vm3, %v1009_v40, %v1001_v42 }
 0x347   : > { %v928_v34 = vmul.f32 %v921_v51, %v1669_v56  ;;  %v1024_v62 = vmul.f32 %v1013_v39, %v1625_v29  ;;  %v929_v10 = vmul.f32 %v917_v50, %v1671_v57  ;;  %v1025_v14 = vmul.f32 %v1017_v23, %v1627_v30 }
 0x348   : > { %v927_v18 = vmul.f32 %v916_v47, %v1671_v57  ;;  %v1023_v42 = vmul.f32 %v1016_v3, %v1627_v30  ;;  %v924_v2 = vmul.f32 %v1983_v0, %v1669_v56  ;;  %v1020_v39 = vmul.f32 %v1011_v15, %v1625_v29 }
 0x349   : > { %1067 = vmatpush.msra.mxu0 %v928_v34  ;;  %1087 = vmatpush.msra.mxu1 %v1024_v62  ;;  %v1021_v40 = vmul.f32 %v1015_v21, %v1627_v30  ;;  %v1018_v47 = vmul.f32 %v1899_v17, %v1625_v29  ;;  %v923_v51 = vmul.f32 %v1885_v6, %v1671_v57  ;;  %v849_v6 = vpop.permute.xlu2 %848  ;;  %vm1291_vm6 = vcmask 1040384  }
 0x34a   : > { %1127 = vmatpush.msrb.mxu2 %v929_v10  ;;  %1147 = vmatpush.msrb.mxu3 %v1025_v14  ;;  %v1019_v56 = vmul.f32 %v1903_v20, %v1627_v30  ;;  %v884_v17 = vsel %vm509_vm7, %v871_v38, %v2016_v44  ;;  %v894_v20 = vmul.f32 %v888_v11, %v1674_v59 }
 0x34b   : > { %1068 = vmatpush.msra.mxu0 %v926_v1  ;;  %1088 = vmatpush.msra.mxu1 %v1022_v12  ;;  %v895_v0 = vmul.f32 %v884_v17, %v1676_v60  ;;  %v892_v15 = vmul.f32 %v1969_v58, %v1674_v59  ;;  %v893_v38 = vmul.f32 %v1965_v55, %v1676_v60 }
 0x34c   : > { %1128 = vmatpush.msrb.mxu2 %v927_v18  ;;  %1148 = vmatpush.msrb.mxu3 %v1023_v42  ;;  %v890_v21 = vmul.f32 %v1925_v31, %v1674_v59  ;;  %v891_v1 = vmul.f32 %v1921_v28, %v1676_v60  ;;  %v980_v12 = vsel %vm551_vm4, %v2042_v49, %v2034_v13 }
 0x34d   : > { %v881_v3 = vpop.permute.xlu1 %880  ;;  %v873_v50 = vpop.permute.xlu0 %872  ;;  %1069 = vmatpush.msra.mxu0 %v924_v2  ;;  %1089 = vmatpush.msra.mxu1 %v1020_v39  ;;  %v984_v58 = vsel %vm551_vm4, %v2034_v13, %v2042_v49  ;;  %v990_v28 = vmul.f32 %v980_v12, %v1630_v32  ;;  %v988_v49 = vmul.f32 %v1987_v4, %v1630_v32  ;;  %v2341_v12 = vld [vmem:[#allocation16_spill] sm:$0xff] }
 0x34e   : > { %v885_v63 = vsel %vm509_vm7, %v873_v50, %v881_v3  ;;  %v889_v29 = vsel %vm509_vm7, %v881_v3, %v873_v50  ;;  %1129 = vmatpush.msrb.mxu2 %v925_v53  ;;  %1149 = vmatpush.msrb.mxu3 %v1021_v40  ;;  %v991_v23 = vmul.f32 %v984_v58, %v1632_v33 }
 0x34f   : > { %v896_v57 = vmul.f32 %v889_v29, %v1674_v59  ;;  %1070 = vmatpush.msra.mxu0 %v922_v54  ;;  %1090 = vmatpush.msra.mxu1 %v1018_v47  ;;  %v897_v30 = vmul.f32 %v885_v63, %v1676_v60  ;;  %v989_v34 = vmul.f32 %v1991_v5, %v1632_v33 }
 0x350   : > { %1130 = vmatpush.msrb.mxu2 %v923_v51  ;;  %1150 = vmatpush.msrb.mxu3 %v1019_v56  ;;  %v986_v10 = vmul.f32 %v1943_v41, %v1630_v32  ;;  %v987_v42 = vmul.f32 %v1947_v43, %v1632_v33  ;;  %v856_v4 = vsel %vm495_vm8, %v2038_v37, %v2036_v9 }
 0x351   : > { %1071 = vmatpush.msra.mxu0 %v896_v57  ;;  %v945_v13 = vpop.permute.xlu2 %944  ;;  %v862_v43 = vmul.f32 %v856_v4, %v1694_v7  ;;  %v860_v54 = vmul.f32 %v2014_v48, %v1694_v7  ;;  %v858_v53 = vmul.f32 %v1917_v27, %v1694_v7  ;;  %v859_v40 = vmul.f32 %v1913_v26, %v1696_v8  ;;  %v2336_v57 = vld [vmem:[#allocation20_spill] sm:$0xff] }
 0x352   : > { %1131 = vmatpush.msrb.mxu2 %v897_v30  ;;  %v948_v47 = vsel %vm537_vm5, %v2040_v35, %v2044_v19  ;;  %v952_v48 = vsel %vm537_vm5, %v2044_v19, %v2040_v35  ;;  %v956_v17 = vmul.f32 %v2020_v61, %v1650_v45  ;;  %v828_v30 = vmul.f32 %v2336_v57, %v1714_v24  ;;  %v2349_v4 = vld [vmem:[#allocation4_spill] sm:$0xff] }
 0x353   : > { %1072 = vmatpush.msra.mxu0 %v894_v20  ;;  %v958_v56 = vmul.f32 %v948_v47, %v1650_v45  ;;  %v959_v29 = vmul.f32 %v952_v48, %v1652_v46  ;;  %v827_v58 = vmul.f32 %v2341_v12, %v1716_v25 }
 0x354   : > { %1132 = vmatpush.msrb.mxu2 %v895_v0  ;;  %v2338_v0 = vld [vmem:[#allocation18_spill] sm:$0xff] }
 0x355   : > { %v977_v44 = vpop.permute.xlu1 %976  ;;  %v969_v62 = vpop.permute.xlu0 %968  ;;  %1073 = vmatpush.msra.mxu0 %v892_v15  ;;  %v957_v15 = vmul.f32 %v2338_v0, %v1652_v46 }
 0x356   : > { %v981_v55 = vsel %vm551_vm4, %v969_v62, %v977_v44  ;;  %v985_v59 = vsel %vm551_vm4, %v977_v44, %v969_v62  ;;  %1133 = vmatpush.msrb.mxu2 %v893_v38  ;;  %v2339_v38 = vld [vmem:[#allocation14_spill] sm:$0xff]  ;;  %v2340_v44 = vld [vmem:[#allocation17_spill] sm:$0xff] }
 0x357   : > { %v992_v31 = vmul.f32 %v981_v55, %v1630_v32  ;;  %1074 = vmatpush.msra.mxu0 %v890_v21  ;;  %v993_v60 = vmul.f32 %v985_v59, %v1632_v33  ;;  %v852_v32 = vsel %vm495_vm8, %v2036_v9, %v2038_v37  ;;  %v861_v37 = vmul.f32 %v2010_v36, %v1696_v8  ;;  %v2342_v55 = vld [vmem:[#allocation15_spill] sm:$0xff] }
 0x358   : > { %1134 = vmatpush.msrb.mxu2 %v891_v1  ;;  %v863_v39 = vmul.f32 %v852_v32, %v1696_v8  ;;  %v954_v21 = vmul.f32 %v2339_v38, %v1650_v45  ;;  %v826_v62 = vmul.f32 %v2340_v44, %v1714_v24  ;;  %v955_v59 = vmul.f32 %v2342_v55, %v1652_v46 }
 0x359   : > { %1091 = vmatpush.msra.mxu1 %v992_v31  ;;  %1151 = vmatpush.msrb.mxu3 %v993_v60  ;;  %v809_v9 = vpop.permute.xlu2 %808  ;;  %v799_v31 = vld [vmem:[%s2295_s8] sm:$0xff] }
 0x35b   : > { %1092 = vmatpush.msra.mxu1 %v990_v28  ;;  %1152 = vmatpush.msrb.mxu3 %v991_v23  ;;  %v2345_v28 = vld [vmem:[#allocation10_spill] sm:$0xff] }
 0x35d   : > { %v841_v14 = vpop.permute.xlu1 %840  ;;  %v2132_v18 = vpop.permute.xlu0 %1038  ;;  %1093 = vmatpush.msra.mxu1 %v988_v49  ;;  %1153 = vmatpush.msrb.mxu3 %v989_v34  ;;  %v2347_v49 = vld [vmem:[#allocation9_spill] sm:$0xff]  ;;  %v2348_v34 = vld [vmem:[#allocation8_spill] sm:$0xff] }
 0x35e   : > { %v853_v2 = vsel %vm495_vm8, %v841_v14, %v849_v6  ;;  %v857_v5 = vsel %vm495_vm8, %v849_v6, %v841_v14  ;;  %v2337_v6 = vld [vmem:[#allocation19_spill] sm:$0xff] }
 0x35f   : > { %v864_v41 = vmul.f32 %v857_v5, %v1694_v7  ;;  %1094 = vmatpush.msra.mxu1 %v986_v10  ;;  %1154 = vmatpush.msrb.mxu3 %v987_v42  ;;  %v865_v33 = vmul.f32 %v853_v2, %v1696_v8  ;;  %v820_v7 = vsel %vm481_vm9, %v2048_v52, %v2046_v22  ;;  %v800_v10 = vld [vmem:[%s2295_s8 + $0x8] sm:$0xff]  ;;  %v2350_v5 = vld [vmem:[#allocation5_spill] sm:$0xff] }
 0x360   : > { %v824_v8 = vsel %vm481_vm9, %v2046_v22, %v2048_v52  ;;  %v831_v63 = vmul.f32 %v820_v7, %v1716_v25  ;;  %v829_v20 = vmul.f32 %v2337_v6, %v1716_v25 }
 0x361   : > { %1075 = vmatpush.msra.mxu0 %v864_v41  ;;  %1135 = vmatpush.msrb.mxu2 %v865_v33  ;;  %v830_v11 = vmul.f32 %v824_v8, %v1714_v24  ;;  %v1031_v1 = vpop.permute.xlu2 %1030  ;;  %v2351_v33 = vld [vmem:[#allocation6_spill] sm:$0xff] }
 0x362   : > { %v1044_v14 = vsel %vm579_vm2, %v1031_v1, %v2132_v18  ;;  %v1048_v42 = vsel %vm579_vm2, %v2132_v18, %v1031_v1 }
 0x363   : > { %1076 = vmatpush.msra.mxu0 %v862_v43  ;;  %1136 = vmatpush.msrb.mxu2 %v863_v39  ;;  %v2352_v43 = vld [vmem:[#allocation7_spill] sm:$0xff]  ;;  %v1055_v18 = vmul.f32 %v1048_v42, %v2350_v5 }
 0x365   : > { %v937_v26 = vpop.permute.xlu1 %936  ;;  %v817_v27 = vpop.permute.xlu0 %816  ;;  %1077 = vmatpush.msra.mxu0 %v860_v54  ;;  %1137 = vmatpush.msrb.mxu2 %v861_v37 }
 0x366   : > { %v949_v36 = vsel %vm537_vm5, %v937_v26, %v945_v13  ;;  %v953_v3 = vsel %vm537_vm5, %v945_v13, %v937_v26  ;;  %v821_v19 = vsel %vm481_vm9, %v809_v9, %v817_v27  ;;  %v825_v35 = vsel %vm481_vm9, %v817_v27, %v809_v9  ;;  %v801_v27 = vld [vmem:[%s2295_s8 + $0x10] sm:$0xff] }
 0x367   : > { %v960_v50 = vmul.f32 %v949_v36, %v1650_v45  ;;  %v832_v22 = vmul.f32 %v825_v35, %v1714_v24  ;;  %1078 = vmatpush.msra.mxu0 %v858_v53  ;;  %v833_v52 = vmul.f32 %v821_v19, %v1716_v25  ;;  %v961_v51 = vmul.f32 %v953_v3, %v1652_v46  ;;  %v2343_v45 = vld [vmem:[#allocation12_spill] sm:$0xff]  ;;  %v2344_v24 = vld [vmem:[#allocation13_spill] sm:$0xff]  ;;  %v2346_v25 = vld [vmem:[#allocation11_spill] sm:$0xff] }
 0x368   : > { %1138 = vmatpush.msrb.mxu2 %v859_v40  ;;  %v1054_v53 = vmul.f32 %v1044_v14, %v2349_v4 }
 0x369   : > { %1079 = vmatpush.msra.mxu0 %v832_v22  ;;  %1095 = vmatpush.msra.mxu1 %v960_v50  ;;  %v1037_v41 = vpop.permute.xlu2 %1036 }
 0x36a   : > { %1139 = vmatpush.msrb.mxu2 %v833_v52  ;;  %1155 = vmatpush.msrb.mxu3 %v961_v51 }
 0x36b   : > { %1080 = vmatpush.msra.mxu0 %v830_v11  ;;  %1096 = vmatpush.msra.mxu1 %v958_v56 }
 0x36c   : > { %1140 = vmatpush.msrb.mxu2 %v831_v63  ;;  %1156 = vmatpush.msrb.mxu3 %v959_v29 }
 0x36d   : > { %v1029_v61 = vpop.permute.xlu1 %1028  ;;  %1081 = vmatpush.msra.mxu0 %v828_v30  ;;  %1097 = vmatpush.msra.mxu1 %v956_v17  ;;  %v1033_v60 = vpop.permute.xlu0 %1032 }
 0x36e   : > { %1141 = vmatpush.msrb.mxu2 %v829_v20  ;;  %1157 = vmatpush.msrb.mxu3 %v957_v15  ;;  %v1043_v39 = vsel %vm579_vm2, %v1029_v61, %v1037_v41  ;;  %v1047_v54 = vsel %vm579_vm2, %v1037_v41, %v1029_v61 }
 0x36f   : > { %1082 = vmatpush.msra.mxu0 %v826_v62  ;;  %1098 = vmatpush.msra.mxu1 %v954_v21  ;;  %v1052_v9 = vmul.f32 %v1043_v39, %v2349_v4  ;;  %v1053_v37 = vmul.f32 %v1047_v54, %v2350_v5 }
 0x370   : > { %1142 = vmatpush.msrb.mxu2 %v827_v58  ;;  %1158 = vmatpush.msrb.mxu3 %v955_v59 }
 0x371   : > { %1083 = vmatmul.f32.vlgmr.msra.gmra.mxu0 %v799_v31  ;;  %1143 = vmatmul.f32.vlgmr.msrb.gmra.mxu2 %v799_v31  ;;  %v1062_v19 = vpop.permute.xlu2 %1061 }
 0x372   : > { %1099 = vmatpush.msra.mxu1 %v2343_v45  ;;  %1159 = vmatpush.msrb.mxu3 %v2344_v24 }
 0x374   : > { %1100 = vmatpush.msra.mxu1 %v2345_v28  ;;  %1160 = vmatpush.msrb.mxu3 %v2346_v25 }
 0x375   : > { %v1041_v46 = vpop.permute.xlu1 %1040  ;;  %v1027_v40 = vpop.permute.xlu0 %1026 }
 0x376   : > { %v1045_v23 = vsel %vm579_vm2, %v1033_v60, %v1041_v46  ;;  %v1049_v13 = vsel %vm579_vm2, %v1041_v46, %v1033_v60  ;;  %1101 = vmatpush.msra.mxu1 %v2347_v49  ;;  %1161 = vmatpush.msrb.mxu3 %v2348_v34  ;;  %v2353_v46 = vlaneseq }
 0x377   : > { %v1056_v2 = vmul.f32 %v1045_v23, %v2349_v4  ;;  %v1057_v32 = vmul.f32 %v1049_v13, %v2350_v5 }
 0x378   : > { %1102 = vmatpush.msra.mxu1 %v2351_v33  ;;  %1162 = vmatpush.msrb.mxu3 %v2352_v43  ;;  %v1228_v23 = vshrl.u32 %v2353_v46, 7  ;;  %vm1296_vm7 = vcmp.lt.s32.totalorder %v2353_v46, 256 }
 0x379   : > { %1103 = vmatmul.f32.vlgmr.msra.gmra.mxu1 %v800_v10  ;;  %1163 = vmatmul.f32.vlgmr.msrb.gmra.mxu3 %v800_v10 }
 0x37a   : > { %1119 = vmatpush.msrb.mxu0 %v1056_v2  ;;  %1179 = vmatpush.msrb.mxu1 %v1057_v32  ;;  %vm1229_vm15 = vcmp.lt.s32.totalorder %v1228_v23, 2 }
 0x37c   : > { %1120 = vmatpush.msrb.mxu0 %v1054_v53  ;;  %1180 = vmatpush.msrb.mxu1 %v1055_v18 }
 0x37d   : > { %v1035_v47 = vpop.permute.xlu1 %1034 }
 0x37e   : > { %v1042_v48 = vsel %vm579_vm2, %v1027_v40, %v1035_v47  ;;  %v1046_v7 = vsel %vm579_vm2, %v1035_v47, %v1027_v40  ;;  %1121 = vmatpush.msrb.mxu0 %v1052_v9  ;;  %1181 = vmatpush.msrb.mxu1 %v1053_v37 }
 0x37f   : > { %v1050_v8 = vmul.f32 %v1042_v48, %v2349_v4  ;;  %v1051_v26 = vmul.f32 %v1046_v7, %v2350_v5 }
 0x381   : > { %1122 = vmatpush.msrb.mxu0 %v1050_v8  ;;  %1182 = vmatpush.msrb.mxu1 %v1051_v26  ;;  %v2354_v26 = vld [vmem:[#allocation2_spill] sm:$0xff] }
 0x382   : > { %1413 = vmatmul.msk.f32.vlgmr.msrb.gmra.mxu0 %vm720_vm11, %v801_v27  ;;  %1414 = vmatmul.msk.f32.vlgmr.msrb.gmra.mxu1 %vm720_vm11, %v801_v27 }
 0x3ee   : > { %v1084_v36 = vpop.f32.mrf.mxu0 }
 0x3ef   : > { %v1085_v35 = vadd.f32 %v1084_v36, %v1062_v19 }
 0x3f4   : > { %v1144_v16 = vpop.f32.mrf.mxu2 }
 0x3f5   : > { %v1145_v50 = vadd.f32 %v1144_v16, %v1062_v19 }
 0x3f6   : > { %v1104_v3 = vpop.f32.mrf.mxu1 }
 0x3f7   : > { %v1105_v52 = vadd.f32 %v1104_v3, %v1085_v35  ;;  %v2355_v35 = vld [vmem:[#allocation3_spill] sm:$0xff] }
 0x3fc   : > { %v1164_v22 = vpop.f32.mrf.mxu3 }
 0x3fd   : > { %v1165_v51 = vadd.f32 %v1164_v22, %v1145_v50 }
 0x3ff   : > { %v1124_v56 = vpop.f32.mrf.mxu0  ;;  %v1184_v11 = vpop.f32.mrf.mxu1 }
 0x400   : > { %v2253_v63 = vadd.f32 %v1124_v56, %v1105_v52  ;;  %v2255_v29 = vadd.f32 %v1184_v11, %v1165_v51 }
 0x402   : > { %v1187_v17 = vadd.f32 2.0, %v2253_v63  ;;  %v1188_v57 = vadd.f32 2.0, %v2255_v29  ;;  %v1230_v27 = vadd.f32 %v2253_v63, %v2354_v26  ;;  %v1231_v50 = vadd.f32 %v2255_v29, %v2355_v35 }
 0x404   : > { %v1415_v30 = vmul.f32 -1.442695, %v1187_v17  ;;  %v1250_v6 = vand.u32 2147483647, %v1187_v17  ;;  %v1416_v20 = vmul.f32 -1.442695, %v1188_v57 }
 0x405   : > { %v1251_v0 = vand.u32 2147483647, %v1188_v57  ;;  %v1248_v13 = vmin.f32 %v1187_v17, 0.0  ;;  %v1249_v42 = vmin.f32 %v1188_v57, 0.0 }
 0x406   : > { %1439 = vpow2.f32 %v1415_v30  ;;  %v1252_v15 = vsub.f32 0.0, %v1250_v6 }
 0x407   : > { %1441 = vpow2.f32 %v1416_v20  ;;  %v1253_v38 = vsub.f32 0.0, %v1251_v0 }
 0x408   : > { %v1254_v21 = vmul.f32 1.442695, %v1252_v15 }
 0x409   : > { %v1256_v44 = vmul.f32 1.442695, %v1253_v38 }
 0x40a   : > { %1443 = vpow2.f32 %v1254_v21 }
 0x40b   : > { %1445 = vpow2.f32 %v1256_v44 }
 0x40c   : > { %v1440_v62 = vpop.eup %1439 }
 0x40d   : > { %v1442_v61 = vpop.eup %1441  ;;  %v1195_v1 = vadd.f32 1.0, %v1440_v62 }
 0x40e   : > { %v1196_v12 = vadd.f32 1.0, %v1442_v61 }
 0x40f   : > { %1447 = vrcp.f32 %v1195_v1  ;;  %v1206_v34 = vand.u32 2147483647, %v1195_v1  ;;  %v1208_v10 = vand.u32 2147483648, %v1195_v1  ;;  %vm1202_vm14 = vweird.f32 %v1195_v1 }
 0x410   : > { %v1444_v58 = vpop.eup %1443  ;;  %1449 = vrcp.f32 %v1196_v12  ;;  %v1223_v32 = vand.u32 2147483648, %v1196_v12  ;;  %v1221_v33 = vand.u32 2147483647, %v1196_v12  ;;  %vm1217_vm2 = vweird.f32 %v1196_v12 }
 0x411   : > { %v1446_v55 = vpop.eup %1445  ;;  %v1258_v59 = vadd.f32 1.0, %v1444_v58  ;;  %v1209_v53 = vor.u32 1.1754944e-38, %v1208_v10  ;;  %vm1207_vm3 = vcmp.eq.f32.partialorder %v1206_v34, 8.507059e+37 }
 0x412   : > { %v1259_v31 = vadd.f32 1.0, %v1446_v55  ;;  %v1224_v47 = vor.u32 1.1754944e-38, %v1223_v32  ;;  %vm1222_vm5 = vcmp.eq.f32.partialorder %v1221_v33, 8.507059e+37 }
 0x413   : > { %1451 = vlog2.f32 %v1258_v59 }
 0x414   : > { %1453 = vlog2.f32 %v1259_v31 }
 0x415   : > { %v1448_v45 = vpop.eup %1447 }
 0x416   : > { %v1450_v24 = vpop.eup %1449  ;;  %v1198_v60 = vmul.f32 %v1448_v45, %v1195_v1  ;;  %vm1203_vm12 = vweird.f32 %v1448_v45 }
 0x417   : > { %v1213_v28 = vmul.f32 %v1450_v24, %v1196_v12  ;;  %vm1218_vm13 = vweird.f32 %v1450_v24  ;;  %vm1204_vm1 = vmor %vm1202_vm14, %vm1203_vm12 }
 0x418   : > { %v1199_v25 = vsub.f32 1.0, %v1198_v60  ;;  %vm1219_vm4 = vmor %vm1217_vm2, %vm1218_vm13 }
 0x419   : > { %v1452_v49 = vpop.eup %1451  ;;  %v1214_v14 = vsub.f32 1.0, %v1213_v28 }
 0x41a   : > { %v1454_v4 = vpop.eup %1453  ;;  %v1200_v2 = vmul.f32 %v1448_v45, %v1199_v25  ;;  %v1261_v5 = vmul.f32 0.6931472, %v1452_v49 }
 0x41b   : > { %v1215_v41 = vmul.f32 %v1450_v24, %v1214_v14  ;;  %v1263_v43 = vmul.f32 0.6931472, %v1454_v4 }
 0x41c   : > { %v1201_v39 = vadd.f32 %v1448_v45, %v1200_v2  ;;  %v1264_v54 = vsub.f32 %v1248_v13, %v1261_v5 }
 0x41d   : > { %v1216_v18 = vadd.f32 %v1450_v24, %v1215_v41  ;;  %v1265_v9 = vsub.f32 %v1249_v42, %v1263_v43 }
 0x41e   : > { %v1205_v37 = vsel %vm1204_vm1, %v1448_v45, %v1201_v39  ;;  %v1268_v40 = vrot.slane %v1264_v54, 4 }
 0x41f   : > { %v1210_v48 = vsel %vm1207_vm3, %v1209_v53, %v1205_v37  ;;  %v1220_v7 = vsel %vm1219_vm4, %v1450_v24, %v1216_v18  ;;  %v1269_v8 = vrot.slane %v1265_v9, 4 }
 0x420   : > { %v1234_v36 = vrot.slane %v1210_v48, 4  ;;  %v1272_v3 = vsel %vm1229_vm15, 0.0, %v1268_v40  ;;  %v1225_v16 = vsel %vm1222_vm5, %v1224_v47, %v1220_v7 }
 0x421   : > { %v1274_v19 = vsel %vm426_vm0, %v1272_v3, 0.0  ;;  %v1235_v22 = vrot.slane %v1225_v16, 4  ;;  %v1273_v52 = vsel %vm1229_vm15, 0.0, %v1269_v8 }
 0x422   : > { %v1275_v51 = vrot.slane %v1274_v19, 4  ;;  %v1281_v56 = vsel %vm426_vm0, %v1273_v52, 0.0  ;;  %v1238_v11 = vmul.f32 %v1234_v36, %v1230_v27 }
 0x423   : > { %v1239_v17 = vmul.f32 %v1235_v22, %v1231_v50  ;;  %v1282_v57 = vrot.slane %v1281_v56, 4 }
 0x424   : > { %v1276_v63 = vadd.f32 %v1275_v51, %v1274_v19  ;;  %v1240_v0 = vsel %vm1229_vm15, %v2354_v26, %v1238_v11 }
 0x425   : > { %v1241_v30 = vsel %vm1229_vm15, %v2355_v35, %v1239_v17  ;;  %v1283_v6 = vadd.f32 %v1282_v57, %v1281_v56 }
 0x426   : > { %v1277_v20 = vrot.slane %v1276_v63, 2  ;;  %v1244_v29 = vrot.slane %v1241_v30, 4 }
 0x427   : > { %v1284_v15 = vrot.slane %v1283_v6, 2 }
 0x428   : > { %v1278_v38 = vadd.f32 %v1277_v20, %v1276_v63  ;;  %v1245_v21 = vsel %vm426_vm0, %v1240_v0, %v1244_v29 }
 0x429   : > { %1247 = vst [vmem:[%s395_s21] sm:$0xff] %v1245_v21  ;;  %v1285_v44 = vadd.f32 %v1284_v15, %v1283_v6 }
 0x42a   : > { %v1279_v62 = vrot.slane %v1278_v38, 1 }
 0x42b   : > { %v1286_v61 = vrot.slane %v1285_v44, 1 }
 0x42c   : > { %v1280_v12 = vadd.f32 %v1279_v62, %v1278_v38 }
 0x42d   : > { %v1287_v1 = vadd.f32 %v1286_v61, %v1285_v44 }
 0x42f   : > { %v1290_v58 = vrot.slane %v1287_v1, 7 }
 0x431   : > { %v1292_v55 = vsel %vm1291_vm6, %v1280_v12, %v1290_v58 }
 0x432   : > { %1298 = vst.msk [vmem:[%s400_s25] sm:$0x3] %vm1296_vm7, %v1292_v55 }
 0x433 PF: > { %s22_s17 = sadd.s32 1, %s1461_s17  }
 0x434   : > { %p19_p4 = scmp.ge.s32.totalorder %s22_s17, 4  }
 0x436   :  { %21 = sbr.rel (!%p19_p4) target bundleno = 1 (0x1), region = 102 }

</bundles_post_ra>
